<compile_context>
chip_gen: v6e
topology: v6e:2x2x1
jax: 0.10.0
libtpu: 0.0.40
codegen_flags: <defaults>
</compile_context>

<pallas_src>
import functools

import jax
import jax.numpy as jnp
from jax.experimental import pallas as pl
from jax.experimental.pallas import tpu as pltpu


# ----------------------------------------------------------------------------
# Fused ViT encoder kernel
# ----------------------------------------------------------------------------
def _layernorm(x, g, b, eps=1e-5):
    mu = jnp.mean(x, axis=-1, keepdims=True)
    xc = x - mu
    var = jnp.mean(xc * xc, axis=-1, keepdims=True)
    return xc * jax.lax.rsqrt(var + eps) * g + b


def vit_encoder_kernel(x0_ref, kmask_ref, wsel_ref,
                       ln1g_ref, ln1b_ref, wqkv_ref, bqkv_ref, wo_ref, bo_ref,
                       ln2g_ref, ln2b_ref, w1_ref, b1_ref, w2_ref, b2_ref,
                       nfg_ref, nfb_ref,
                       out_ref, xs_ref, heads_ref, *, n_heads):
    M, D = xs_ref.shape                       # M = B_blk * Tp (padded tokens)
    b_blk = out_ref.shape[0]
    tp = M // b_blk                           # padded tokens per image
    dk = D // n_heads
    F = w1_ref.shape[-1]
    layer = pl.program_id(1)

    # ---- layer 0: load the pre-computed embedding (cls + pos already folded) ----
    @pl.when(layer == 0)
    def _init():
        xs_ref[...] = x0_ref[...]

    x = xs_ref[...]                           # [M, D] f32 residual stream

    # ---- Multi-head self-attention (pre-norm) ----
    y = _layernorm(x, ln1g_ref[0], ln1b_ref[0]).astype(jnp.bfloat16)
    qkv = (jnp.dot(y, wqkv_ref[0], preferred_element_type=jnp.float32)
           + bqkv_ref[0]).astype(jnp.bfloat16)          # [M, 3D] bf16

    kmask = kmask_ref[...].reshape(1, 1, tp)            # 0 / -1e30 additive (f32)
    scale = dk ** -0.5
    for h in range(n_heads):                  # static unroll; matmuls stay batched
        qh = qkv[:, h * dk:(h + 1) * dk].reshape(b_blk, tp, dk)
        kh = qkv[:, D + h * dk:D + (h + 1) * dk].reshape(b_blk, tp, dk)
        vh = qkv[:, 2 * D + h * dk:2 * D + (h + 1) * dk].reshape(b_blk, tp, dk)
        s = jax.lax.dot_general(qh, kh, (((2,), (2,)), ((0,), (0,))),
                                preferred_element_type=jnp.float32) * scale
        s = s + kmask
        m = jnp.max(s, axis=-1, keepdims=True)
        e = jnp.exp(s - m)
        a = (e * pl.reciprocal(jnp.sum(e, axis=-1, keepdims=True), approx=True)
             ).astype(jnp.bfloat16)
        oh = jax.lax.dot_general(a, vh, (((2,), (1,)), ((0,), (0,))),
                                 preferred_element_type=jnp.float32)
        # write head output into its lane slice of the contiguous [M, D] buffer
        heads_ref[:, h * dk:(h + 1) * dk] = oh.reshape(M, dk).astype(jnp.bfloat16)

    # one dense [M,D]x[D,D] out-projection (K=D fills the MXU; no per-head adds)
    attn = jnp.dot(heads_ref[...], wo_ref[0], preferred_element_type=jnp.float32)
    x = x + attn + bo_ref[0]

    # ---- MLP (pre-norm), exact erf GELU, chunked along F ----
    y2 = _layernorm(x, ln2g_ref[0], ln2b_ref[0]).astype(jnp.bfloat16)
    fc = 512 if (F > 512 and F % 512 == 0) else F       # chunk width (static)
    ff = jnp.zeros((M, D), jnp.float32)
    for c in range(0, F, fc):
        h1 = (jnp.dot(y2, w1_ref[0, :, c:c + fc],
                      preferred_element_type=jnp.float32)
              + b1_ref[0, :, c:c + fc])
        h1 = 0.5 * h1 * (1.0 + jax.lax.erf(h1 * (2.0 ** -0.5)))
        ff = ff + jnp.dot(h1.astype(jnp.bfloat16), w2_ref[0, c:c + fc, :],
                          preferred_element_type=jnp.float32)
    x = x + ff + b2_ref[0]
    xs_ref[...] = x

    # ---- final LayerNorm + mean over real tokens (last layer only) ----
    @pl.when(layer == pl.num_programs(1) - 1)
    def _finalize():
        xn = _layernorm(x, nfg_ref[...], nfb_ref[...])
        w = wsel_ref[...].reshape(1, tp, 1)              # 1/T for real tokens else 0
        out_ref[:, 0, :] = jnp.sum(xn.reshape(b_blk, tp, D) * w, axis=1)


# ----------------------------------------------------------------------------
# Wrapper
# ----------------------------------------------------------------------------
def _pick_batch_block(batch):
    """Largest divisor of batch that is <= 16 while keeping >= 2 grid steps along
    the 'parallel' batch axis when possible (megacore on v7x)."""
    target = min(16, max(1, batch // 2))
    for cand in range(target, 0, -1):
        if batch % cand == 0:
            return cand
    return 1


def vit_encoder_forward(img, params):
    """img: [B, C, H, W] -> [B, 1, D] (token mean of the encoded sequence)."""
    B, C, Hi, Wi = img.shape
    P = params["patch_size"]
    n_heads = params["n_heads"]
    wp = params["wp"]
    PP, D = wp.shape
    depth = params["wqkv"].shape[0]
    F = params["w1"].shape[-1]
    N = (Hi // P) * (Wi // P)
    T = N + 1                                  # cls + patches
    Tp = ((T + 7) // 8) * 8                    # token axis padded to sublane multiple
    Bb = _pick_batch_block(B)
    M = Bb * Tp

    # --- patch embedding outside the kernel (pure data movement + one matmul) ---
    pt = img.reshape(B, C, Hi // P, P, Wi // P, P)
    pt = jnp.transpose(pt, (0, 2, 4, 1, 3, 5)).reshape(B, N, PP)
    x_patch = pt @ wp + params["bp"] + params["pos"][1:][None]       # [B, N, D]
    cls_row = params["cls"] + params["pos"][0:1]                     # [1, D]
    x0 = jnp.zeros((B, Tp, D), jnp.float32)
    x0 = x0.at[:, 0, :].set(jnp.broadcast_to(cls_row, (B, D)))
    x0 = x0.at[:, 1:T, :].set(x_patch)
    x0 = x0.reshape(B * Tp, D)

    # --- tiny constants: key-padding mask & token-mean selector (hoisted) ---
    tok = jnp.arange(Tp)
    kmask = jnp.where(tok < T, 0.0, -1e30).astype(jnp.float32).reshape(1, Tp)
    wsel = jnp.where(tok < T, 1.0 / T, 0.0).astype(jnp.float32).reshape(1, Tp)

    # --- bf16 copies of the streamed matmul weights (MXU inputs) ---
    wqkv = params["wqkv"].astype(jnp.bfloat16)
    wo = params["wo"].astype(jnp.bfloat16)
    w1 = params["w1"].astype(jnp.bfloat16)
    w2 = params["w2"].astype(jnp.bfloat16)

    grid = (B // Bb, depth)
    lspec = lambda shape: pl.BlockSpec(
        shape, lambda b, l: (l,) + (0,) * (len(shape) - 1))   # streamed per layer
    cspec = lambda shape: pl.BlockSpec(
        shape, lambda b, l: (0,) * len(shape))                # resident constants

    kernel = functools.partial(vit_encoder_kernel, n_heads=n_heads)
    out = pl.pallas_call(
        kernel,
        out_shape=jax.ShapeDtypeStruct((B, 1, D), jnp.float32),
        grid=grid,
        in_specs=[
            pl.BlockSpec((M, D), lambda b, l: (b, 0)),         # x0 (const over layers)
            cspec((1, Tp)), cspec((1, Tp)),                    # kmask, wsel
            lspec((1, 1, D)), lspec((1, 1, D)),                # LN1 gamma/beta
            lspec((1, D, 3 * D)), lspec((1, 1, 3 * D)),        # fused QKV weight/bias
            lspec((1, D, D)), lspec((1, 1, D)),                # attn out-proj
            lspec((1, 1, D)), lspec((1, 1, D)),                # LN2 gamma/beta
            lspec((1, D, F)), lspec((1, 1, F)),                # MLP fc1
            lspec((1, F, D)), lspec((1, 1, D)),                # MLP fc2
            cspec((1, D)), cspec((1, D)),                      # final LayerNorm
        ],
        out_specs=pl.BlockSpec((Bb, 1, D), lambda b, l: (b, 0, 0)),
        scratch_shapes=[pltpu.VMEM((M, D), jnp.float32),       # residual-stream carry
                        pltpu.VMEM((M, D), jnp.bfloat16)],     # per-head output buffer
        compiler_params=pltpu.CompilerParams(
            dimension_semantics=("parallel", "arbitrary"),
            vmem_limit_bytes=64 * 1024 * 1024),
    )(x0, kmask, wsel,
      params["ln1g"], params["ln1b"], wqkv, params["bqkv"], wo, params["bo"],
      params["ln2g"], params["ln2b"], w1, params["b1"], w2, params["b2"],
      params["nfg"], params["nfb"])
    return out


# ----------------------------------------------------------------------------
# Deterministic parameter init (shapes follow the PyTorch module; timm-style
# pre-norm Block with qkv_bias=True assumed). Stored already transposed/stacked.
# ----------------------------------------------------------------------------
def init_vit_params(key, *, img_size, patch_size, in_chans, embed_dim,
                    depth, num_heads, mlp_ratio):
    D = embed_dim
    F = int(D * mlp_ratio)
    PP = in_chans * patch_size * patch_size
    N = (img_size // patch_size) ** 2
    T = N + 1

    k = jax.random.split(key, 6 + depth)

    def nrm(kk, shape, s=0.02):
        return s * jax.random.normal(kk, shape, jnp.float32)

    params = dict(
        patch_size=patch_size, n_heads=num_heads,
        wp=nrm(k[0], (PP, D)), bp=nrm(k[1], (1, D)),
        cls=nrm(k[2], (1, D)), pos=nrm(k[3], (T, D)),
        nfg=1.0 + 0.1 * jax.random.normal(k[4], (1, D), jnp.float32),
        nfb=0.02 * jax.random.normal(k[5], (1, D), jnp.float32),
    )

    ln1g, ln1b, ln2g, ln2b = [], [], [], []
    wqkv, bqkv, wo, bo, w1, b1, w2, b2 = [], [], [], [], [], [], [], []
    for i in range(depth):
        kk = jax.random.split(k[6 + i], 12)
        ln1g.append(1.0 + 0.1 * jax.random.normal(kk[0], (1, D), jnp.float32))
        ln1b.append(0.02 * jax.random.normal(kk[1], (1, D), jnp.float32))
        wqkv.append(nrm(kk[2], (D, 3 * D)))
        bqkv.append(nrm(kk[3], (1, 3 * D)))
        wo.append(nrm(kk[4], (D, D)))
        bo.append(nrm(kk[5], (1, D)))
        ln2g.append(1.0 + 0.1 * jax.random.normal(kk[6], (1, D), jnp.float32))
        ln2b.append(0.02 * jax.random.normal(kk[7], (1, D), jnp.float32))
        w1.append(nrm(kk[8], (D, F)))
        b1.append(nrm(kk[9], (1, F)))
        w2.append(nrm(kk[10], (F, D)))
        b2.append(nrm(kk[11], (1, D)))

    stack = lambda xs: jnp.stack(xs, axis=0)
    params.update(
        ln1g=stack(ln1g), ln1b=stack(ln1b), ln2g=stack(ln2g), ln2b=stack(ln2b),
        wqkv=stack(wqkv), bqkv=stack(bqkv), wo=stack(wo), bo=stack(bo),
        w1=stack(w1), b1=stack(b1), w2=stack(w2), b2=stack(b2),
    )
    return params


# ----------------------------------------------------------------------------
# Pure-JAX reference (eval-mode forward of the PyTorch module, f32 throughout)
# ----------------------------------------------------------------------------
def vit_encoder_reference(img, params):
    B, C, Hi, Wi = img.shape
    P = params["patch_size"]
    Hh = params["n_heads"]
    PP, D = params["wp"].shape
    depth = params["wqkv"].shape[0]
    dk = D // Hh
    N = (Hi // P) * (Wi // P)

    pt = img.reshape(B, C, Hi // P, P, Wi // P, P)
    pt = jnp.transpose(pt, (0, 2, 4, 1, 3, 5)).reshape(B, N, PP)
    x = pt @ params["wp"] + params["bp"] + params["pos"][1:][None]
    cls = (params["cls"] + params["pos"][0:1])[None]
    x = jnp.concatenate([jnp.broadcast_to(cls, (B, 1, D)), x], axis=1)

    def ln(v, g, b):
        mu = v.mean(-1, keepdims=True)
        var = ((v - mu) ** 2).mean(-1, keepdims=True)
        return (v - mu) / jnp.sqrt(var + 1e-5) * g + b

    for l in range(depth):
        y = ln(x, params["ln1g"][l], params["ln1b"][l])
        qkv = y @ params["wqkv"][l] + params["bqkv"][l]
        q, k, v = qkv[..., :D], qkv[..., D:2 * D], qkv[..., 2 * D:]
        q = q.reshape(B, -1, Hh, dk).transpose(0, 2, 1, 3)
        k = k.reshape(B, -1, Hh, dk).transpose(0, 2, 1, 3)
        v = v.reshape(B, -1, Hh, dk).transpose(0, 2, 1, 3)
        s = (q * dk ** -0.5) @ jnp.swapaxes(k, -1, -2)
        a = jax.nn.softmax(s, axis=-1)
        o = (a @ v).transpose(0, 2, 1, 3).reshape(B, -1, D)
        x = x + (o @ params["wo"][l] + params["bo"][l])
        y2 = ln(x, params["ln2g"][l], params["ln2b"][l])
        h1 = y2 @ params["w1"][l] + params["b1"][l]
        h1 = 0.5 * h1 * (1.0 + jax.lax.erf(h1 * (2.0 ** -0.5)))
        x = x + (h1 @ params["w2"][l] + params["b2"][l])

    x = ln(x, params["nfg"], params["nfb"])
    return x.mean(axis=1, keepdims=True)


# ----------------------------------------------------------------------------
if __name__ == "__main__":
    img_size, patch_size, in_chans = 16, 4, 1
    embed_dim, depth, num_heads, mlp_ratio = 32, 2, 4, 4.0
    batch = 2

    key = jax.random.PRNGKey(0)
    kx, kp = jax.random.split(key)
    img = jax.random.normal(kx, (batch, in_chans, img_size, img_size), jnp.float32)
    params = init_vit_params(kp, img_size=img_size, patch_size=patch_size,
                             in_chans=in_chans, embed_dim=embed_dim, depth=depth,
                             num_heads=num_heads, mlp_ratio=mlp_ratio)

    fwd = jax.jit(lambda x: vit_encoder_forward(x, params))
    out = fwd(img)
    jax.block_until_ready(out)

    assert out.shape == (batch, 1, embed_dim), out.shape
    assert bool(jnp.all(jnp.isfinite(out)))
    ref = vit_encoder_reference(img, params)
    assert bool(jnp.allclose(out, ref, atol=2e-2, rtol=2e-2)), \
        float(jnp.max(jnp.abs(out - ref)))
    print("KERNEL_OK")
</pallas_src>

<mosaic_0001>
module attributes {stable_mosaic.version = 11 : i64} {
  func.func @vit_encoder_kernel(%arg0: i32, %arg1: i32, %arg2: memref<24x32xf32, #tpu.memory_space<vmem>>, %arg3: memref<1x24xf32, #tpu.memory_space<vmem>>, %arg4: memref<1x24xf32, #tpu.memory_space<vmem>>, %arg5: memref<1x1x32xf32, #tpu.memory_space<vmem>>, %arg6: memref<1x1x32xf32, #tpu.memory_space<vmem>>, %arg7: memref<1x32x96xbf16, #tpu.memory_space<vmem>>, %arg8: memref<1x1x96xf32, #tpu.memory_space<vmem>>, %arg9: memref<1x32x32xbf16, #tpu.memory_space<vmem>>, %arg10: memref<1x1x32xf32, #tpu.memory_space<vmem>>, %arg11: memref<1x1x32xf32, #tpu.memory_space<vmem>>, %arg12: memref<1x1x32xf32, #tpu.memory_space<vmem>>, %arg13: memref<1x32x128xbf16, #tpu.memory_space<vmem>>, %arg14: memref<1x1x128xf32, #tpu.memory_space<vmem>>, %arg15: memref<1x128x32xbf16, #tpu.memory_space<vmem>>, %arg16: memref<1x1x32xf32, #tpu.memory_space<vmem>>, %arg17: memref<1x32xf32, #tpu.memory_space<vmem>>, %arg18: memref<1x32xf32, #tpu.memory_space<vmem>>, %arg19: memref<1x1x32xf32, #tpu.memory_space<vmem>>, %arg20: memref<24x32xf32, #tpu.memory_space<vmem>>, %arg21: memref<24x32xbf16, #tpu.memory_space<vmem>>) attributes {dimension_semantics = [#tpu.dimension_semantics<parallel>, #tpu.dimension_semantics<arbitrary>], iteration_bounds = array<i64: 2, 2>, scalar_prefetch = 0 : i64, scratch_operands = 2 : i64, tpu.core_type = #tpu.core_type<tc>, window_params = [{transform_indices = @transform_0, window_bounds = array<i64: 24, 32>}, {pipeline_mode = #tpu.pipeline_mode<synchronous>, transform_indices = @transform_1, window_bounds = array<i64: 1, 24>}, {pipeline_mode = #tpu.pipeline_mode<synchronous>, transform_indices = @transform_2, window_bounds = array<i64: 1, 24>}, {transform_indices = @transform_3, window_bounds = array<i64: 1, 1, 32>}, {transform_indices = @transform_4, window_bounds = array<i64: 1, 1, 32>}, {transform_indices = @transform_5, window_bounds = array<i64: 1, 32, 96>}, {transform_indices = @transform_6, window_bounds = array<i64: 1, 1, 96>}, {transform_indices = @transform_7, window_bounds = array<i64: 1, 32, 32>}, {transform_indices = @transform_8, window_bounds = array<i64: 1, 1, 32>}, {transform_indices = @transform_9, window_bounds = array<i64: 1, 1, 32>}, {transform_indices = @transform_10, window_bounds = array<i64: 1, 1, 32>}, {transform_indices = @transform_11, window_bounds = array<i64: 1, 32, 128>}, {transform_indices = @transform_12, window_bounds = array<i64: 1, 1, 128>}, {transform_indices = @transform_13, window_bounds = array<i64: 1, 128, 32>}, {transform_indices = @transform_14, window_bounds = array<i64: 1, 1, 32>}, {pipeline_mode = #tpu.pipeline_mode<synchronous>, transform_indices = @transform_15, window_bounds = array<i64: 1, 32>}, {pipeline_mode = #tpu.pipeline_mode<synchronous>, transform_indices = @transform_16, window_bounds = array<i64: 1, 32>}, {transform_indices = @transform_17, window_bounds = array<i64: 1, 1, 32>}]} {
    %c0_i32 = arith.constant 0 : i32
    %0 = arith.cmpi eq, %arg1, %c0_i32 : i32
    %1 = arith.extui %0 : i1 to i32
    %c0_i32_0 = arith.constant 0 : i32
    %2 = arith.cmpi ne, %1, %c0_i32_0 : i32
    scf.if %2 {
      %c0_87 = arith.constant 0 : index
      %c0_88 = arith.constant 0 : index
      %207 = vector.load %arg2[%c0_87, %c0_88] : memref<24x32xf32, #tpu.memory_space<vmem>>, vector<24x32xf32>
      %c0_89 = arith.constant 0 : index
      %c0_90 = arith.constant 0 : index
      %208 = vector.load %arg20[%c0_89, %c0_90] : memref<24x32xf32, #tpu.memory_space<vmem>>, vector<24x32xf32>
      tpu.vector_store %arg20[%c0_89, %c0_90], %207 {strides = array<i32>} : memref<24x32xf32, #tpu.memory_space<vmem>>, vector<24x32xf32>,
    } else {
    }
    %c0 = arith.constant 0 : index
    %c0_1 = arith.constant 0 : index
    %3 = vector.load %arg20[%c0, %c0_1] : memref<24x32xf32, #tpu.memory_space<vmem>>, vector<24x32xf32>
    %c0_2 = arith.constant 0 : index
    %c0_3 = arith.constant 0 : index
    %c0_4 = arith.constant 0 : index
    %4 = vector.load %arg5[%c0_2, %c0_3, %c0_4] : memref<1x1x32xf32, #tpu.memory_space<vmem>>, vector<1x1x32xf32>
    %5 = vector.shape_cast %4 : vector<1x1x32xf32> to vector<1x32xf32>
    %c0_5 = arith.constant 0 : index
    %c0_6 = arith.constant 0 : index
    %c0_7 = arith.constant 0 : index
    %6 = vector.load %arg6[%c0_5, %c0_6, %c0_7] : memref<1x1x32xf32, #tpu.memory_space<vmem>>, vector<1x1x32xf32>
    %7 = vector.shape_cast %6 : vector<1x1x32xf32> to vector<1x32xf32>
    %cst = arith.constant dense<0.000000e+00> : vector<24xf32>
    %8 = vector.multi_reduction <add>, %3, %cst [1] : vector<24x32xf32> to vector<24xf32>
    %9 = vector.shape_cast %8 : vector<24xf32> to vector<24x1xf32>
    %cst_8 = arith.constant 3.200000e+01 : f32
    %10 = vector.broadcast %cst_8 : f32 to vector<24x1xf32>
    %11 = arith.divf %9, %10 : vector<24x1xf32>
    %12 = vector.broadcast %11 : vector<24x1xf32> to vector<24x32xf32>
    %13 = arith.subf %3, %12 : vector<24x32xf32>
    %14 = arith.mulf %13, %13 : vector<24x32xf32>
    %cst_9 = arith.constant dense<0.000000e+00> : vector<24xf32>
    %15 = vector.multi_reduction <add>, %14, %cst_9 [1] : vector<24x32xf32> to vector<24xf32>
    %16 = vector.shape_cast %15 : vector<24xf32> to vector<24x1xf32>
    %cst_10 = arith.constant 3.200000e+01 : f32
    %17 = vector.broadcast %cst_10 : f32 to vector<24x1xf32>
    %18 = arith.divf %16, %17 : vector<24x1xf32>
    %cst_11 = arith.constant 9.99999974E-6 : f32
    %19 = vector.broadcast %cst_11 : f32 to vector<24x1xf32>
    %20 = arith.addf %18, %19 : vector<24x1xf32>
    %21 = math.rsqrt %20 : vector<24x1xf32>
    %22 = vector.broadcast %21 : vector<24x1xf32> to vector<24x32xf32>
    %23 = arith.mulf %13, %22 : vector<24x32xf32>
    %24 = vector.broadcast %5 : vector<1x32xf32> to vector<24x32xf32>
    %25 = arith.mulf %23, %24 : vector<24x32xf32>
    %26 = vector.broadcast %7 : vector<1x32xf32> to vector<24x32xf32>
    %27 = arith.addf %25, %26 : vector<24x32xf32>
    %28 = arith.truncf %27 : vector<24x32xf32> to vector<24x32xbf16>
    %c0_12 = arith.constant 0 : index
    %c0_13 = arith.constant 0 : index
    %c0_14 = arith.constant 0 : index
    %29 = vector.load %arg7[%c0_12, %c0_13, %c0_14] : memref<1x32x96xbf16, #tpu.memory_space<vmem>>, vector<1x32x96xbf16>
    %30 = vector.shape_cast %29 : vector<1x32x96xbf16> to vector<32x96xbf16>
    %cst_15 = arith.constant dense<0.000000e+00> : vector<24x96xf32>
    %31 = tpu.matmul %28, %30, %cst_15 {dimension_numbers = #tpu.dot_dimension_numbers<[1], [0], [0], [1], [0, 0, 1, 1], [], []>} : vector<24x32xbf16>, vector<32x96xbf16>, vector<24x96xf32> -> vector<24x96xf32>
    %c0_16 = arith.constant 0 : index
    %c0_17 = arith.constant 0 : index
    %c0_18 = arith.constant 0 : index
    %32 = vector.load %arg8[%c0_16, %c0_17, %c0_18] : memref<1x1x96xf32, #tpu.memory_space<vmem>>, vector<1x1x96xf32>
    %33 = vector.shape_cast %32 : vector<1x1x96xf32> to vector<1x96xf32>
    %34 = vector.broadcast %33 : vector<1x96xf32> to vector<24x96xf32>
    %35 = arith.addf %31, %34 : vector<24x96xf32>
    %36 = arith.truncf %35 : vector<24x96xf32> to vector<24x96xbf16>
    %c0_19 = arith.constant 0 : index
    %c0_20 = arith.constant 0 : index
    %37 = vector.load %arg3[%c0_19, %c0_20] : memref<1x24xf32, #tpu.memory_space<vmem>>, vector<1x24xf32>
    %38 = vector.shape_cast %37 : vector<1x24xf32> to vector<1x1x24xf32>
    %39 = vector.extract_strided_slice %36 {offsets = [0, 0], sizes = [24, 8], strides = [1, 1]} : vector<24x96xbf16> to vector<24x8xbf16>
    %40 = vector.shape_cast %39 : vector<24x8xbf16> to vector<1x24x8xbf16>
    %41 = vector.extract_strided_slice %36 {offsets = [0, 32], sizes = [24, 8], strides = [1, 1]} : vector<24x96xbf16> to vector<24x8xbf16>
    %42 = vector.shape_cast %41 : vector<24x8xbf16> to vector<1x24x8xbf16>
    %43 = vector.extract_strided_slice %36 {offsets = [0, 64], sizes = [24, 8], strides = [1, 1]} : vector<24x96xbf16> to vector<24x8xbf16>
    %44 = vector.shape_cast %43 : vector<24x8xbf16> to vector<1x24x8xbf16>
    %cst_21 = arith.constant dense<0.000000e+00> : vector<1x24x24xf32>
    %45 = tpu.matmul %40, %42, %cst_21 {dimension_numbers = #tpu.dot_dimension_numbers<[2], [2], [1], [1], [0, 0, 0, 1, 1, 1], [0], [0]>} : vector<1x24x8xbf16>, vector<1x24x8xbf16>, vector<1x24x24xf32> -> vector<1x24x24xf32>
    %cst_22 = arith.constant 0.353553385 : f32
    %46 = vector.broadcast %cst_22 : f32 to vector<1x24x24xf32>
    %47 = arith.mulf %45, %46 : vector<1x24x24xf32>
    %48 = vector.broadcast %38 : vector<1x1x24xf32> to vector<1x24x24xf32>
    %49 = arith.addf %47, %48 : vector<1x24x24xf32>
    %cst_23 = arith.constant dense<0xFF800000> : vector<1x24xf32>
    %50 = vector.multi_reduction <maximumf>, %49, %cst_23 [2] : vector<1x24x24xf32> to vector<1x24xf32>
    %51 = vector.shape_cast %50 : vector<1x24xf32> to vector<1x24x1xf32>
    %52 = vector.broadcast %51 : vector<1x24x1xf32> to vector<1x24x24xf32>
    %53 = arith.subf %49, %52 : vector<1x24x24xf32>
    %54 = math.exp %53 : vector<1x24x24xf32>
    %cst_24 = arith.constant dense<0.000000e+00> : vector<1x24xf32>
    %55 = vector.multi_reduction <add>, %54, %cst_24 [2] : vector<1x24x24xf32> to vector<1x24xf32>
    %56 = vector.shape_cast %55 : vector<1x24xf32> to vector<1x24x1xf32>
    %57 = tpu.reciprocal %56 {approx = true} : vector<1x24x1xf32> -> vector<1x24x1xf32>
    %58 = vector.broadcast %57 : vector<1x24x1xf32> to vector<1x24x24xf32>
    %59 = arith.mulf %54, %58 : vector<1x24x24xf32>
    %60 = arith.truncf %59 : vector<1x24x24xf32> to vector<1x24x24xbf16>
    %cst_25 = arith.constant dense<0.000000e+00> : vector<1x24x8xf32>
    %61 = tpu.matmul %60, %44, %cst_25 {dimension_numbers = #tpu.dot_dimension_numbers<[2], [1], [1], [2], [0, 0, 0, 1, 1, 2], [0], [0]>} : vector<1x24x24xbf16>, vector<1x24x8xbf16>, vector<1x24x8xf32> -> vector<1x24x8xf32>
    %62 = vector.shape_cast %61 : vector<1x24x8xf32> to vector<24x8xf32>
    %63 = arith.truncf %62 : vector<24x8xf32> to vector<24x8xbf16>
    %c0_26 = arith.constant 0 : index
    %c0_27 = arith.constant 0 : index
    %64 = vector.load %arg21[%c0_26, %c0_27] : memref<24x32xbf16, #tpu.memory_space<vmem>>, vector<24x8xbf16>
    tpu.vector_store %arg21[%c0_26, %c0_27], %63 {strides = array<i32>} : memref<24x32xbf16, #tpu.memory_space<vmem>>, vector<24x8xbf16>,
    %65 = vector.extract_strided_slice %36 {offsets = [0, 8], sizes = [24, 8], strides = [1, 1]} : vector<24x96xbf16> to vector<24x8xbf16>
    %66 = vector.shape_cast %65 : vector<24x8xbf16> to vector<1x24x8xbf16>
    %67 = vector.extract_strided_slice %36 {offsets = [0, 40], sizes = [24, 8], strides = [1, 1]} : vector<24x96xbf16> to vector<24x8xbf16>
    %68 = vector.shape_cast %67 : vector<24x8xbf16> to vector<1x24x8xbf16>
    %69 = vector.extract_strided_slice %36 {offsets = [0, 72], sizes = [24, 8], strides = [1, 1]} : vector<24x96xbf16> to vector<24x8xbf16>
    %70 = vector.shape_cast %69 : vector<24x8xbf16> to vector<1x24x8xbf16>
    %cst_28 = arith.constant dense<0.000000e+00> : vector<1x24x24xf32>
    %71 = tpu.matmul %66, %68, %cst_28 {dimension_numbers = #tpu.dot_dimension_numbers<[2], [2], [1], [1], [0, 0, 0, 1, 1, 1], [0], [0]>} : vector<1x24x8xbf16>, vector<1x24x8xbf16>, vector<1x24x24xf32> -> vector<1x24x24xf32>
    %cst_29 = arith.constant 0.353553385 : f32
    %72 = vector.broadcast %cst_29 : f32 to vector<1x24x24xf32>
    %73 = arith.mulf %71, %72 : vector<1x24x24xf32>
    %74 = vector.broadcast %38 : vector<1x1x24xf32> to vector<1x24x24xf32>
    %75 = arith.addf %73, %74 : vector<1x24x24xf32>
    %cst_30 = arith.constant dense<0xFF800000> : vector<1x24xf32>
    %76 = vector.multi_reduction <maximumf>, %75, %cst_30 [2] : vector<1x24x24xf32> to vector<1x24xf32>
    %77 = vector.shape_cast %76 : vector<1x24xf32> to vector<1x24x1xf32>
    %78 = vector.broadcast %77 : vector<1x24x1xf32> to vector<1x24x24xf32>
    %79 = arith.subf %75, %78 : vector<1x24x24xf32>
    %80 = math.exp %79 : vector<1x24x24xf32>
    %cst_31 = arith.constant dense<0.000000e+00> : vector<1x24xf32>
    %81 = vector.multi_reduction <add>, %80, %cst_31 [2] : vector<1x24x24xf32> to vector<1x24xf32>
    %82 = vector.shape_cast %81 : vector<1x24xf32> to vector<1x24x1xf32>
    %83 = tpu.reciprocal %82 {approx = true} : vector<1x24x1xf32> -> vector<1x24x1xf32>
    %84 = vector.broadcast %83 : vector<1x24x1xf32> to vector<1x24x24xf32>
    %85 = arith.mulf %80, %84 : vector<1x24x24xf32>
    %86 = arith.truncf %85 : vector<1x24x24xf32> to vector<1x24x24xbf16>
    %cst_32 = arith.constant dense<0.000000e+00> : vector<1x24x8xf32>
    %87 = tpu.matmul %86, %70, %cst_32 {dimension_numbers = #tpu.dot_dimension_numbers<[2], [1], [1], [2], [0, 0, 0, 1, 1, 2], [0], [0]>} : vector<1x24x24xbf16>, vector<1x24x8xbf16>, vector<1x24x8xf32> -> vector<1x24x8xf32>
    %88 = vector.shape_cast %87 : vector<1x24x8xf32> to vector<24x8xf32>
    %89 = arith.truncf %88 : vector<24x8xf32> to vector<24x8xbf16>
    %c0_33 = arith.constant 0 : index
    %c8 = arith.constant 8 : index
    %90 = vector.load %arg21[%c0_33, %c8] : memref<24x32xbf16, #tpu.memory_space<vmem>>, vector<24x8xbf16>
    tpu.vector_store %arg21[%c0_33, %c8], %89 {strides = array<i32>} : memref<24x32xbf16, #tpu.memory_space<vmem>>, vector<24x8xbf16>,
    %91 = vector.extract_strided_slice %36 {offsets = [0, 16], sizes = [24, 8], strides = [1, 1]} : vector<24x96xbf16> to vector<24x8xbf16>
    %92 = vector.shape_cast %91 : vector<24x8xbf16> to vector<1x24x8xbf16>
    %93 = vector.extract_strided_slice %36 {offsets = [0, 48], sizes = [24, 8], strides = [1, 1]} : vector<24x96xbf16> to vector<24x8xbf16>
    %94 = vector.shape_cast %93 : vector<24x8xbf16> to vector<1x24x8xbf16>
    %95 = vector.extract_strided_slice %36 {offsets = [0, 80], sizes = [24, 8], strides = [1, 1]} : vector<24x96xbf16> to vector<24x8xbf16>
    %96 = vector.shape_cast %95 : vector<24x8xbf16> to vector<1x24x8xbf16>
    %cst_34 = arith.constant dense<0.000000e+00> : vector<1x24x24xf32>
    %97 = tpu.matmul %92, %94, %cst_34 {dimension_numbers = #tpu.dot_dimension_numbers<[2], [2], [1], [1], [0, 0, 0, 1, 1, 1], [0], [0]>} : vector<1x24x8xbf16>, vector<1x24x8xbf16>, vector<1x24x24xf32> -> vector<1x24x24xf32>
    %cst_35 = arith.constant 0.353553385 : f32
    %98 = vector.broadcast %cst_35 : f32 to vector<1x24x24xf32>
    %99 = arith.mulf %97, %98 : vector<1x24x24xf32>
    %100 = vector.broadcast %38 : vector<1x1x24xf32> to vector<1x24x24xf32>
    %101 = arith.addf %99, %100 : vector<1x24x24xf32>
    %cst_36 = arith.constant dense<0xFF800000> : vector<1x24xf32>
    %102 = vector.multi_reduction <maximumf>, %101, %cst_36 [2] : vector<1x24x24xf32> to vector<1x24xf32>
    %103 = vector.shape_cast %102 : vector<1x24xf32> to vector<1x24x1xf32>
    %104 = vector.broadcast %103 : vector<1x24x1xf32> to vector<1x24x24xf32>
    %105 = arith.subf %101, %104 : vector<1x24x24xf32>
    %106 = math.exp %105 : vector<1x24x24xf32>
    %cst_37 = arith.constant dense<0.000000e+00> : vector<1x24xf32>
    %107 = vector.multi_reduction <add>, %106, %cst_37 [2] : vector<1x24x24xf32> to vector<1x24xf32>
    %108 = vector.shape_cast %107 : vector<1x24xf32> to vector<1x24x1xf32>
    %109 = tpu.reciprocal %108 {approx = true} : vector<1x24x1xf32> -> vector<1x24x1xf32>
    %110 = vector.broadcast %109 : vector<1x24x1xf32> to vector<1x24x24xf32>
    %111 = arith.mulf %106, %110 : vector<1x24x24xf32>
    %112 = arith.truncf %111 : vector<1x24x24xf32> to vector<1x24x24xbf16>
    %cst_38 = arith.constant dense<0.000000e+00> : vector<1x24x8xf32>
    %113 = tpu.matmul %112, %96, %cst_38 {dimension_numbers = #tpu.dot_dimension_numbers<[2], [1], [1], [2], [0, 0, 0, 1, 1, 2], [0], [0]>} : vector<1x24x24xbf16>, vector<1x24x8xbf16>, vector<1x24x8xf32> -> vector<1x24x8xf32>
    %114 = vector.shape_cast %113 : vector<1x24x8xf32> to vector<24x8xf32>
    %115 = arith.truncf %114 : vector<24x8xf32> to vector<24x8xbf16>
    %c0_39 = arith.constant 0 : index
    %c16 = arith.constant 16 : index
    %116 = vector.load %arg21[%c0_39, %c16] : memref<24x32xbf16, #tpu.memory_space<vmem>>, vector<24x8xbf16>
    tpu.vector_store %arg21[%c0_39, %c16], %115 {strides = array<i32>} : memref<24x32xbf16, #tpu.memory_space<vmem>>, vector<24x8xbf16>,
    %117 = vector.extract_strided_slice %36 {offsets = [0, 24], sizes = [24, 8], strides = [1, 1]} : vector<24x96xbf16> to vector<24x8xbf16>
    %118 = vector.shape_cast %117 : vector<24x8xbf16> to vector<1x24x8xbf16>
    %119 = vector.extract_strided_slice %36 {offsets = [0, 56], sizes = [24, 8], strides = [1, 1]} : vector<24x96xbf16> to vector<24x8xbf16>
    %120 = vector.shape_cast %119 : vector<24x8xbf16> to vector<1x24x8xbf16>
    %121 = vector.extract_strided_slice %36 {offsets = [0, 88], sizes = [24, 8], strides = [1, 1]} : vector<24x96xbf16> to vector<24x8xbf16>
    %122 = vector.shape_cast %121 : vector<24x8xbf16> to vector<1x24x8xbf16>
    %cst_40 = arith.constant dense<0.000000e+00> : vector<1x24x24xf32>
    %123 = tpu.matmul %118, %120, %cst_40 {dimension_numbers = #tpu.dot_dimension_numbers<[2], [2], [1], [1], [0, 0, 0, 1, 1, 1], [0], [0]>} : vector<1x24x8xbf16>, vector<1x24x8xbf16>, vector<1x24x24xf32> -> vector<1x24x24xf32>
    %cst_41 = arith.constant 0.353553385 : f32
    %124 = vector.broadcast %cst_41 : f32 to vector<1x24x24xf32>
    %125 = arith.mulf %123, %124 : vector<1x24x24xf32>
    %126 = vector.broadcast %38 : vector<1x1x24xf32> to vector<1x24x24xf32>
    %127 = arith.addf %125, %126 : vector<1x24x24xf32>
    %cst_42 = arith.constant dense<0xFF800000> : vector<1x24xf32>
    %128 = vector.multi_reduction <maximumf>, %127, %cst_42 [2] : vector<1x24x24xf32> to vector<1x24xf32>
    %129 = vector.shape_cast %128 : vector<1x24xf32> to vector<1x24x1xf32>
    %130 = vector.broadcast %129 : vector<1x24x1xf32> to vector<1x24x24xf32>
    %131 = arith.subf %127, %130 : vector<1x24x24xf32>
    %132 = math.exp %131 : vector<1x24x24xf32>
    %cst_43 = arith.constant dense<0.000000e+00> : vector<1x24xf32>
    %133 = vector.multi_reduction <add>, %132, %cst_43 [2] : vector<1x24x24xf32> to vector<1x24xf32>
    %134 = vector.shape_cast %133 : vector<1x24xf32> to vector<1x24x1xf32>
    %135 = tpu.reciprocal %134 {approx = true} : vector<1x24x1xf32> -> vector<1x24x1xf32>
    %136 = vector.broadcast %135 : vector<1x24x1xf32> to vector<1x24x24xf32>
    %137 = arith.mulf %132, %136 : vector<1x24x24xf32>
    %138 = arith.truncf %137 : vector<1x24x24xf32> to vector<1x24x24xbf16>
    %cst_44 = arith.constant dense<0.000000e+00> : vector<1x24x8xf32>
    %139 = tpu.matmul %138, %122, %cst_44 {dimension_numbers = #tpu.dot_dimension_numbers<[2], [1], [1], [2], [0, 0, 0, 1, 1, 2], [0], [0]>} : vector<1x24x24xbf16>, vector<1x24x8xbf16>, vector<1x24x8xf32> -> vector<1x24x8xf32>
    %140 = vector.shape_cast %139 : vector<1x24x8xf32> to vector<24x8xf32>
    %141 = arith.truncf %140 : vector<24x8xf32> to vector<24x8xbf16>
    %c0_45 = arith.constant 0 : index
    %c24 = arith.constant 24 : index
    %142 = vector.load %arg21[%c0_45, %c24] : memref<24x32xbf16, #tpu.memory_space<vmem>>, vector<24x8xbf16>
    tpu.vector_store %arg21[%c0_45, %c24], %141 {strides = array<i32>} : memref<24x32xbf16, #tpu.memory_space<vmem>>, vector<24x8xbf16>,
    %c0_46 = arith.constant 0 : index
    %c0_47 = arith.constant 0 : index
    %143 = vector.load %arg21[%c0_46, %c0_47] : memref<24x32xbf16, #tpu.memory_space<vmem>>, vector<24x32xbf16>
    %c0_48 = arith.constant 0 : index
    %c0_49 = arith.constant 0 : index
    %c0_50 = arith.constant 0 : index
    %144 = vector.load %arg9[%c0_48, %c0_49, %c0_50] : memref<1x32x32xbf16, #tpu.memory_space<vmem>>, vector<1x32x32xbf16>
    %145 = vector.shape_cast %144 : vector<1x32x32xbf16> to vector<32x32xbf16>
    %cst_51 = arith.constant dense<0.000000e+00> : vector<24x32xf32>
    %146 = tpu.matmul %143, %145, %cst_51 {dimension_numbers = #tpu.dot_dimension_numbers<[1], [0], [0], [1], [0, 0, 1, 1], [], []>} : vector<24x32xbf16>, vector<32x32xbf16>, vector<24x32xf32> -> vector<24x32xf32>
    %147 = arith.addf %3, %146 : vector<24x32xf32>
    %c0_52 = arith.constant 0 : index
    %c0_53 = arith.constant 0 : index
    %c0_54 = arith.constant 0 : index
    %148 = vector.load %arg10[%c0_52, %c0_53, %c0_54] : memref<1x1x32xf32, #tpu.memory_space<vmem>>, vector<1x1x32xf32>
    %149 = vector.shape_cast %148 : vector<1x1x32xf32> to vector<1x32xf32>
    %150 = vector.broadcast %149 : vector<1x32xf32> to vector<24x32xf32>
    %151 = arith.addf %147, %150 : vector<24x32xf32>
    %c0_55 = arith.constant 0 : index
    %c0_56 = arith.constant 0 : index
    %c0_57 = arith.constant 0 : index
    %152 = vector.load %arg11[%c0_55, %c0_56, %c0_57] : memref<1x1x32xf32, #tpu.memory_space<vmem>>, vector<1x1x32xf32>
    %153 = vector.shape_cast %152 : vector<1x1x32xf32> to vector<1x32xf32>
    %c0_58 = arith.constant 0 : index
    %c0_59 = arith.constant 0 : index
    %c0_60 = arith.constant 0 : index
    %154 = vector.load %arg12[%c0_58, %c0_59, %c0_60] : memref<1x1x32xf32, #tpu.memory_space<vmem>>, vector<1x1x32xf32>
    %155 = vector.shape_cast %154 : vector<1x1x32xf32> to vector<1x32xf32>
    %cst_61 = arith.constant dense<0.000000e+00> : vector<24xf32>
    %156 = vector.multi_reduction <add>, %151, %cst_61 [1] : vector<24x32xf32> to vector<24xf32>
    %157 = vector.shape_cast %156 : vector<24xf32> to vector<24x1xf32>
    %cst_62 = arith.constant 3.200000e+01 : f32
    %158 = vector.broadcast %cst_62 : f32 to vector<24x1xf32>
    %159 = arith.divf %157, %158 : vector<24x1xf32>
    %160 = vector.broadcast %159 : vector<24x1xf32> to vector<24x32xf32>
    %161 = arith.subf %151, %160 : vector<24x32xf32>
    %162 = arith.mulf %161, %161 : vector<24x32xf32>
    %cst_63 = arith.constant dense<0.000000e+00> : vector<24xf32>
    %163 = vector.multi_reduction <add>, %162, %cst_63 [1] : vector<24x32xf32> to vector<24xf32>
    %164 = vector.shape_cast %163 : vector<24xf32> to vector<24x1xf32>
    %cst_64 = arith.constant 3.200000e+01 : f32
    %165 = vector.broadcast %cst_64 : f32 to vector<24x1xf32>
    %166 = arith.divf %164, %165 : vector<24x1xf32>
    %cst_65 = arith.constant 9.99999974E-6 : f32
    %167 = vector.broadcast %cst_65 : f32 to vector<24x1xf32>
    %168 = arith.addf %166, %167 : vector<24x1xf32>
    %169 = math.rsqrt %168 : vector<24x1xf32>
    %170 = vector.broadcast %169 : vector<24x1xf32> to vector<24x32xf32>
    %171 = arith.mulf %161, %170 : vector<24x32xf32>
    %172 = vector.broadcast %153 : vector<1x32xf32> to vector<24x32xf32>
    %173 = arith.mulf %171, %172 : vector<24x32xf32>
    %174 = vector.broadcast %155 : vector<1x32xf32> to vector<24x32xf32>
    %175 = arith.addf %173, %174 : vector<24x32xf32>
    %176 = arith.truncf %175 : vector<24x32xf32> to vector<24x32xbf16>
    %cst_66 = arith.constant 0.000000e+00 : f32
    %177 = vector.broadcast %cst_66 : f32 to vector<24x32xf32>
    %c0_67 = arith.constant 0 : index
    %c0_68 = arith.constant 0 : index
    %c0_69 = arith.constant 0 : index
    %178 = vector.load %arg13[%c0_67, %c0_68, %c0_69] : memref<1x32x128xbf16, #tpu.memory_space<vmem>>, vector<1x32x128xbf16>
    %179 = vector.shape_cast %178 : vector<1x32x128xbf16> to vector<32x128xbf16>
    %cst_70 = arith.constant dense<0.000000e+00> : vector<24x128xf32>
    %180 = tpu.matmul %176, %179, %cst_70 {dimension_numbers = #tpu.dot_dimension_numbers<[1], [0], [0], [1], [0, 0, 1, 1], [], []>} : vector<24x32xbf16>, vector<32x128xbf16>, vector<24x128xf32> -> vector<24x128xf32>
    %c0_71 = arith.constant 0 : index
    %c0_72 = arith.constant 0 : index
    %c0_73 = arith.constant 0 : index
    %181 = vector.load %arg14[%c0_71, %c0_72, %c0_73] : memref<1x1x128xf32, #tpu.memory_space<vmem>>, vector<1x1x128xf32>
    %182 = vector.shape_cast %181 : vector<1x1x128xf32> to vector<1x128xf32>
    %183 = vector.broadcast %182 : vector<1x128xf32> to vector<24x128xf32>
    %184 = arith.addf %180, %183 : vector<24x128xf32>
    %cst_74 = arith.constant 5.000000e-01 : f32
    %185 = vector.broadcast %cst_74 : f32 to vector<24x128xf32>
    %186 = arith.mulf %185, %184 : vector<24x128xf32>
    %cst_75 = arith.constant 0.707106769 : f32
    %187 = vector.broadcast %cst_75 : f32 to vector<24x128xf32>
    %188 = arith.mulf %184, %187 : vector<24x128xf32>
    %189 = math.erf %188 : vector<24x128xf32>
    %cst_76 = arith.constant 1.000000e+00 : f32
    %190 = vector.broadcast %cst_76 : f32 to vector<24x128xf32>
    %191 = arith.addf %190, %189 : vector<24x128xf32>
    %192 = arith.mulf %186, %191 : vector<24x128xf32>
    %193 = arith.truncf %192 : vector<24x128xf32> to vector<24x128xbf16>
    %c0_77 = arith.constant 0 : index
    %c0_78 = arith.constant 0 : index
    %c0_79 = arith.constant 0 : index
    %194 = vector.load %arg15[%c0_77, %c0_78, %c0_79] : memref<1x128x32xbf16, #tpu.memory_space<vmem>>, vector<1x128x32xbf16>
    %195 = vector.shape_cast %194 : vector<1x128x32xbf16> to vector<128x32xbf16>
    %cst_80 = arith.constant dense<0.000000e+00> : vector<24x32xf32>
    %196 = tpu.matmul %193, %195, %cst_80 {dimension_numbers = #tpu.dot_dimension_numbers<[1], [0], [0], [1], [0, 0, 1, 1], [], []>} : vector<24x128xbf16>, vector<128x32xbf16>, vector<24x32xf32> -> vector<24x32xf32>
    %197 = arith.addf %177, %196 : vector<24x32xf32>
    %198 = arith.addf %151, %197 : vector<24x32xf32>
    %c0_81 = arith.constant 0 : index
    %c0_82 = arith.constant 0 : index
    %c0_83 = arith.constant 0 : index
    %199 = vector.load %arg16[%c0_81, %c0_82, %c0_83] : memref<1x1x32xf32, #tpu.memory_space<vmem>>, vector<1x1x32xf32>
    %200 = vector.shape_cast %199 : vector<1x1x32xf32> to vector<1x32xf32>
    %201 = vector.broadcast %200 : vector<1x32xf32> to vector<24x32xf32>
    %202 = arith.addf %198, %201 : vector<24x32xf32>
    %c0_84 = arith.constant 0 : index
    %c0_85 = arith.constant 0 : index
    %203 = vector.load %arg20[%c0_84, %c0_85] : memref<24x32xf32, #tpu.memory_space<vmem>>, vector<24x32xf32>
    tpu.vector_store %arg20[%c0_84, %c0_85], %202 {strides = array<i32>} : memref<24x32xf32, #tpu.memory_space<vmem>>, vector<24x32xf32>,
    %c1_i32 = arith.constant 1 : i32
    %204 = arith.cmpi eq, %arg1, %c1_i32 : i32
    %205 = arith.extui %204 : i1 to i32
    %c0_i32_86 = arith.constant 0 : i32
    %206 = arith.cmpi ne, %205, %c0_i32_86 : i32
    scf.if %206 {
      %c0_87 = arith.constant 0 : index
      %c0_88 = arith.constant 0 : index
      %207 = vector.load %arg17[%c0_87, %c0_88] : memref<1x32xf32, #tpu.memory_space<vmem>>, vector<1x32xf32>
      %c0_89 = arith.constant 0 : index
      %c0_90 = arith.constant 0 : index
      %208 = vector.load %arg18[%c0_89, %c0_90] : memref<1x32xf32, #tpu.memory_space<vmem>>, vector<1x32xf32>
      %cst_91 = arith.constant dense<0.000000e+00> : vector<24xf32>
      %209 = vector.multi_reduction <add>, %202, %cst_91 [1] : vector<24x32xf32> to vector<24xf32>
      %210 = vector.shape_cast %209 : vector<24xf32> to vector<24x1xf32>
      %cst_92 = arith.constant 3.200000e+01 : f32
      %211 = vector.broadcast %cst_92 : f32 to vector<24x1xf32>
      %212 = arith.divf %210, %211 : vector<24x1xf32>
      %213 = vector.broadcast %212 : vector<24x1xf32> to vector<24x32xf32>
      %214 = arith.subf %202, %213 : vector<24x32xf32>
      %215 = arith.mulf %214, %214 : vector<24x32xf32>
      %cst_93 = arith.constant dense<0.000000e+00> : vector<24xf32>
      %216 = vector.multi_reduction <add>, %215, %cst_93 [1] : vector<24x32xf32> to vector<24xf32>
      %217 = vector.shape_cast %216 : vector<24xf32> to vector<24x1xf32>
      %cst_94 = arith.constant 3.200000e+01 : f32
      %218 = vector.broadcast %cst_94 : f32 to vector<24x1xf32>
      %219 = arith.divf %217, %218 : vector<24x1xf32>
      %cst_95 = arith.constant 9.99999974E-6 : f32
      %220 = vector.broadcast %cst_95 : f32 to vector<24x1xf32>
      %221 = arith.addf %219, %220 : vector<24x1xf32>
      %222 = math.rsqrt %221 : vector<24x1xf32>
      %223 = vector.broadcast %222 : vector<24x1xf32> to vector<24x32xf32>
      %224 = arith.mulf %214, %223 : vector<24x32xf32>
      %225 = vector.broadcast %207 : vector<1x32xf32> to vector<24x32xf32>
      %226 = arith.mulf %224, %225 : vector<24x32xf32>
      %227 = vector.broadcast %208 : vector<1x32xf32> to vector<24x32xf32>
      %228 = arith.addf %226, %227 : vector<24x32xf32>
      %c0_96 = arith.constant 0 : index
      %c0_97 = arith.constant 0 : index
      %229 = vector.load %arg4[%c0_96, %c0_97] : memref<1x24xf32, #tpu.memory_space<vmem>>, vector<1x24xf32>
      %230 = vector.shape_cast %229 : vector<1x24xf32> to vector<1x24x1xf32>
      %231 = vector.shape_cast %228 : vector<24x32xf32> to vector<1x24x32xf32>
      %232 = vector.broadcast %230 : vector<1x24x1xf32> to vector<1x24x32xf32>
      %233 = arith.mulf %231, %232 : vector<1x24x32xf32>
      %cst_98 = arith.constant dense<0.000000e+00> : vector<1x32xf32>
      %234 = vector.multi_reduction <add>, %233, %cst_98 [1] : vector<1x24x32xf32> to vector<1x32xf32>
      %c0_99 = arith.constant 0 : index
      %c0_100 = arith.constant 0 : index
      %c0_101 = arith.constant 0 : index
      %235 = vector.load %arg19[%c0_99, %c0_100, %c0_101] : memref<1x1x32xf32, #tpu.memory_space<vmem>>, vector<1x1x32xf32>
      %236 = vector.shape_cast %235 : vector<1x1x32xf32> to vector<1x32xf32>
      %237 = vector.shape_cast %234 : vector<1x32xf32> to vector<1x1x32xf32>
      tpu.vector_store %arg19[%c0_99, %c0_100, %c0_101], %237 {strides = array<i32>} : memref<1x1x32xf32, #tpu.memory_space<vmem>>, vector<1x1x32xf32>,
    } else {
    }
    return
  }
  func.func @transform_0(%arg0: i32, %arg1: i32) -> (i32, i32) {
    %c0_i32 = arith.constant 0 : i32
    %c0_i32_0 = arith.constant 0 : i32
    return %arg0, %c0_i32 : i32, i32
  }
  func.func @transform_1(%arg0: i32, %arg1: i32) -> (i32, i32) {
    %c0_i32 = arith.constant 0 : i32
    %c0_i32_0 = arith.constant 0 : i32
    %c0_i32_1 = arith.constant 0 : i32
    return %c0_i32, %c0_i32_0 : i32, i32
  }
  func.func @transform_2(%arg0: i32, %arg1: i32) -> (i32, i32) {
    %c0_i32 = arith.constant 0 : i32
    %c0_i32_0 = arith.constant 0 : i32
    %c0_i32_1 = arith.constant 0 : i32
    return %c0_i32, %c0_i32_0 : i32, i32
  }
  func.func @transform_3(%arg0: i32, %arg1: i32) -> (i32, i32, i32) {
    %c0_i32 = arith.constant 0 : i32
    %c0_i32_0 = arith.constant 0 : i32
    %c0_i32_1 = arith.constant 0 : i32
    return %arg1, %c0_i32, %c0_i32_0 : i32, i32, i32
  }
  func.func @transform_4(%arg0: i32, %arg1: i32) -> (i32, i32, i32) {
    %c0_i32 = arith.constant 0 : i32
    %c0_i32_0 = arith.constant 0 : i32
    %c0_i32_1 = arith.constant 0 : i32
    return %arg1, %c0_i32, %c0_i32_0 : i32, i32, i32
  }
  func.func @transform_5(%arg0: i32, %arg1: i32) -> (i32, i32, i32) {
    %c0_i32 = arith.constant 0 : i32
    %c0_i32_0 = arith.constant 0 : i32
    %c0_i32_1 = arith.constant 0 : i32
    return %arg1, %c0_i32, %c0_i32_0 : i32, i32, i32
  }
  func.func @transform_6(%arg0: i32, %arg1: i32) -> (i32, i32, i32) {
    %c0_i32 = arith.constant 0 : i32
    %c0_i32_0 = arith.constant 0 : i32
    %c0_i32_1 = arith.constant 0 : i32
    return %arg1, %c0_i32, %c0_i32_0 : i32, i32, i32
  }
  func.func @transform_7(%arg0: i32, %arg1: i32) -> (i32, i32, i32) {
    %c0_i32 = arith.constant 0 : i32
    %c0_i32_0 = arith.constant 0 : i32
    %c0_i32_1 = arith.constant 0 : i32
    return %arg1, %c0_i32, %c0_i32_0 : i32, i32, i32
  }
  func.func @transform_8(%arg0: i32, %arg1: i32) -> (i32, i32, i32) {
    %c0_i32 = arith.constant 0 : i32
    %c0_i32_0 = arith.constant 0 : i32
    %c0_i32_1 = arith.constant 0 : i32
    return %arg1, %c0_i32, %c0_i32_0 : i32, i32, i32
  }
  func.func @transform_9(%arg0: i32, %arg1: i32) -> (i32, i32, i32) {
    %c0_i32 = arith.constant 0 : i32
    %c0_i32_0 = arith.constant 0 : i32
    %c0_i32_1 = arith.constant 0 : i32
    return %arg1, %c0_i32, %c0_i32_0 : i32, i32, i32
  }
  func.func @transform_10(%arg0: i32, %arg1: i32) -> (i32, i32, i32) {
    %c0_i32 = arith.constant 0 : i32
    %c0_i32_0 = arith.constant 0 : i32
    %c0_i32_1 = arith.constant 0 : i32
    return %arg1, %c0_i32, %c0_i32_0 : i32, i32, i32
  }
  func.func @transform_11(%arg0: i32, %arg1: i32) -> (i32, i32, i32) {
    %c0_i32 = arith.constant 0 : i32
    %c0_i32_0 = arith.constant 0 : i32
    %c0_i32_1 = arith.constant 0 : i32
    return %arg1, %c0_i32, %c0_i32_0 : i32, i32, i32
  }
  func.func @transform_12(%arg0: i32, %arg1: i32) -> (i32, i32, i32) {
    %c0_i32 = arith.constant 0 : i32
    %c0_i32_0 = arith.constant 0 : i32
    %c0_i32_1 = arith.constant 0 : i32
    return %arg1, %c0_i32, %c0_i32_0 : i32, i32, i32
  }
  func.func @transform_13(%arg0: i32, %arg1: i32) -> (i32, i32, i32) {
    %c0_i32 = arith.constant 0 : i32
    %c0_i32_0 = arith.constant 0 : i32
    %c0_i32_1 = arith.constant 0 : i32
    return %arg1, %c0_i32, %c0_i32_0 : i32, i32, i32
  }
  func.func @transform_14(%arg0: i32, %arg1: i32) -> (i32, i32, i32) {
    %c0_i32 = arith.constant 0 : i32
    %c0_i32_0 = arith.constant 0 : i32
    %c0_i32_1 = arith.constant 0 : i32
    return %arg1, %c0_i32, %c0_i32_0 : i32, i32, i32
  }
  func.func @transform_15(%arg0: i32, %arg1: i32) -> (i32, i32) {
    %c0_i32 = arith.constant 0 : i32
    %c0_i32_0 = arith.constant 0 : i32
    %c0_i32_1 = arith.constant 0 : i32
    return %c0_i32, %c0_i32_0 : i32, i32
  }
  func.func @transform_16(%arg0: i32, %arg1: i32) -> (i32, i32) {
    %c0_i32 = arith.constant 0 : i32
    %c0_i32_0 = arith.constant 0 : i32
    %c0_i32_1 = arith.constant 0 : i32
    return %c0_i32, %c0_i32_0 : i32, i32
  }
  func.func @transform_17(%arg0: i32, %arg1: i32) -> (i32, i32, i32) {
    %c0_i32 = arith.constant 0 : i32
    %c0_i32_0 = arith.constant 0 : i32
    %c0_i32_1 = arith.constant 0 : i32
    return %arg0, %c0_i32, %c0_i32_0 : i32, i32, i32
  }
}

</mosaic_0001>

<bundles_post_ra>
// kernel: _lambda_.1
= control target key start
LH: loop header
LB: loop body
LE: loop exit
PB: predicated region body
PF: predicated region fallthrough
CT: control target
= control target key end

     0   :  { %s3434_s0 = inlined_call_operand.vmem [shape: f32[48,32], index: 0, kind: input, shape index: {}]   ;;  %s3435_s1 = inlined_call_operand.vmem [shape: f32[1,24], index: 1, kind: input, shape index: {}]   ;;  %s3436_s2 = inlined_call_operand.vmem [shape: f32[1,24], index: 2, kind: input, shape index: {}]   ;;  %s3437_s3 = inlined_call_operand.vmem [shape: f32[2,1,32], index: 3, kind: input, shape index: {}]   ;;  %s3438_s4 = inlined_call_operand.vmem [shape: f32[2,1,32], index: 4, kind: input, shape index: {}]   ;;  %s3439_s5 = inlined_call_operand.vmem [shape: bf16[2,32,96], index: 5, kind: input, shape index: {}]   ;;  %s3440_s6 = inlined_call_operand.vmem [shape: f32[2,1,96], index: 6, kind: input, shape index: {}]   ;;  %s3441_s7 = inlined_call_operand.vmem [shape: bf16[2,32,32], index: 7, kind: input, shape index: {}]   ;;  %s3442_s8 = inlined_call_operand.vmem [shape: f32[2,1,32], index: 8, kind: input, shape index: {}]   ;;  %s3443_s9 = inlined_call_operand.vmem [shape: f32[2,1,32], index: 9, kind: input, shape index: {}]   ;;  %s3444_s10 = inlined_call_operand.vmem [shape: f32[2,1,32], index: 10, kind: input, shape index: {}]   ;;  %s3445_s11 = inlined_call_operand.vmem [shape: bf16[2,32,128], index: 11, kind: input, shape index: {}]   ;;  %s3446_s12 = inlined_call_operand.vmem [shape: f32[2,1,128], index: 12, kind: input, shape index: {}]   ;;  %s3447_s13 = inlined_call_operand.vmem [shape: bf16[2,128,32], index: 13, kind: input, shape index: {}]   ;;  %s3448_s14 = inlined_call_operand.vmem [shape: f32[2,1,32], index: 14, kind: input, shape index: {}]   ;;  %s3449_s15 = inlined_call_operand.vmem [shape: f32[1,32], index: 15, kind: input, shape index: {}]   ;;  %s3450_s16 = inlined_call_operand.vmem [shape: f32[1,32], index: 16, kind: input, shape index: {}]   ;;  %s3451_s17 = inlined_call_operand.hbm [shape: f32[2,1,32], index: 17, kind: output, shape index: {}]  }
   0x1   :  { %3465 = sst [smem:[#allocation19_spill]] %s3434_s0 }
   0x2   :  { %3466 = sst [smem:[#allocation20_spill]] %s3435_s1 }
   0x3   :  { %3467 = sst [smem:[#allocation21_spill]] %s3436_s2 }
   0x4   :  { %3468 = sst [smem:[#allocation22_spill]] %s3437_s3 }
   0x5   :  { %3469 = sst [smem:[#allocation23_spill]] %s3439_s5 }
   0x6   :  { %3470 = sst [smem:[#allocation24_spill]] %s3441_s7 }
   0x7   :  { %3471 = sst [smem:[#allocation25_spill]] %s3449_s15 }
   0x8   :  { %3472 = sst [smem:[#allocation26_spill]] %s3450_s16 }
   0x9   :  { %3473 = sst [smem:[#allocation27_spill]] %s3451_s17 }
   0xa   :  { %22 = vsyncpa [#allocation5], 0 }
   0xb   :  { %24 = vsyncpa [#allocation5 + $0x1], 0  ;;  %s3001_s24 = smov 0   ;;  %s3003_s25 = smov 0  }
   0xc   :  { %s3005_s26 = smov 0   ;;  %s3007_s27 = smov 0  }
   0xd   :  { %s3009_s28 = smov 0   ;;  %s3011_s29 = smov 0  }
   0xe   :  { %s3013_s0 = smov 0   ;;  %s3015_s30 = smov 0  }
   0xf LB: > { %3474 = sst [smem:[#allocation7_spill]] %s2866_s24  ;;  %s2358_s18 = sadd.s32 4294967295, %s2894_s30   ;;  %s2894_s30 = sphi %s3015_s30, %s30_s30   ;;  %s2890_s0 = sphi %s3013_s0, %s3517_s0   ;;  %s2886_s29 = sphi %s3011_s29, %s3516_s29   ;;  %s2882_s28 = sphi %s3009_s28, %s3515_s28   ;;  %s2878_s27 = sphi %s3007_s27, %s3514_s27   ;;  %s2874_s26 = sphi %s3005_s26, %s3513_s26   ;;  %s2870_s25 = sphi %s3003_s25, %s3519_s25   ;;  %s2866_s24 = sphi %s3001_s24, %s3518_s24  }
  0x10   : > { %3475 = sst [smem:[#allocation8_spill]] %s2874_s26  ;;  %s2359_s19 = sadd.s32 4294967294, %s2894_s30  }
  0x11   : > { %3476 = sst [smem:[#allocation9_spill]] %s2878_s27  ;;  %s39_s1 = sadd.s32 1, %s2886_s29 }
  0x12   : > { %3477 = sst [smem:[#allocation10_spill]] %s2882_s28  ;;  %p40_p0 = scmp.ge.s32.totalorder %s39_s1, 2 }
  0x13   : > { %3478 = sst [smem:[#allocation11_spill]] %s2886_s29  ;;  %s42_s20 = sadd.s32 1, %s2890_s0 }
  0x14   : > { %3479 = sst [smem:[#allocation12_spill]] %s2890_s0  ;;  %p481_p1 = scmp.ne.s32.totalorder %s2874_s26, %s2870_s25 }
  0x15   : > { %3480 = sst [smem:[#allocation13_spill]] %s2894_s30  ;;  %p482_p2 = scmp.eq.s32.totalorder %s2358_s18, 3 }
  0x16   : > { %s3521_s1 = smov (%p40_p0, %s39_s1), 0  ;;  %s3523_s20 = smov (!%p40_p0, %s42_s20), %s2890_s0 }
  0x17   : > { %3481 = sst [smem:[#allocation14_spill]] %s3521_s1  ;;  %p3050_p3 = por %p482_p2, %p481_p1 }
  0x18   : > { %p487_p4 = scmp.ne.s32.totalorder %s2870_s25, %s2866_s24  ;;  %p44_p5 = scmp.ge.s32.totalorder %s3523_s20, 2 }
  0x19   : > { %s3482_s21 = scalar_select %p3050_p3, 1, 0 }
  0x1a   : > { %p488_p6 = scmp.eq.s32.totalorder %s2359_s19, 3  ;;  %p2362_p7 = scmp.ge.s32.totalorder %s2894_s30, 1 }
  0x1b   : > { %3483 = sst [smem:[#allocation15_spill]] %s3482_s21  ;;  %p607_p8 = scmp.lt.s32.totalorder %s2894_s30, 5 }
  0x1c   : > { %s3525_s20 = smov (%p44_p5, %s3523_s20), 0  ;;  %p3060_p9 = por %p488_p6, %p487_p4 }
  0x1d   : > { %3484 = sst [smem:[#allocation16_spill]] %s3525_s20  ;;  %p608_p10 = pnand %p2362_p7, %p607_p8 }
  0x1e   : > { %s3485_s22 = scalar_select %p3060_p9, 1, 0 }
  0x1f   : > { %s468_s23 = ssub.s32 %s2890_s0, %s3525_s20  ;;  %s471_s18 = sadd.s32 1, %s2874_s26 }
  0x20   : > { %3486 = sst [smem:[#allocation17_spill]] %s3485_s22  ;;  %p469_p11 = scmp.eq.s32.totalorder %s468_s23, 0 }
  0x21   : > { %611 = sbr.rel (%p608_p10) target bundleno = 4516 (0x11a4), region = 88  ;;  %p708_p12 = scmp.lt.s32.totalorder (!%p608_p10), %s2878_s27, 1 }
  0x22   : > { %s3068_s1 = scalar_select %p469_p11, %s2874_s26, %s471_s18  }
  0x23   : > { %s702_s29 = smul.u32 (!%p608_p10), 3, %s2882_s28  ;;  %s3489_s21 = sld [smem:[#allocation19_spill]] (!%p608_p10) }
  0x24   : > { %3487 = sst [smem:[#allocation18_spill]] %s3068_s1  ;;  %s3492_s16 = sand.u32 (!%p608_p10), 1, %s2870_s25  }
  0x25   : > { %p703_p13 = scmp.lt.s32.totalorder (!%p608_p10), %s702_s29, 5  ;;  %s3490_s5 = sld [smem:[#allocation23_spill]] (!%p608_p10) }
  0x26   : > { %s3074_s24 = scalar_select %p708_p12, %s2878_s27, 1 }
  0x27   : > { %s3527_s29 = smov (!%p703_p13, %s702_s29), 5  ;;  %s3491_s7 = sld [smem:[#allocation24_spill]] }
  0x28   : > { %s2363_s26 = sshll.u32 %s3527_s29, 3  ;;  %s2439_s22 = sshll.u32 %s3074_s24, 4 }
  0x29   : > { %s706_s28 = scalar_lea.vmem %s3489_s21, %s2363_s26  ;;  %s732_s30 = scalar_lea.vmem %s3443_s9, %s3074_s24 }
  0x2a   : > { %s3117_s23 = scalar_lea.vmem %s3445_s11, %s2439_s22  ;;  %s743_s18 = scalar_lea.vmem %s3446_s12, %s3074_s24 }
  0x2b   : > { %s3091_s2 = scalar_lea.vmem %s3490_s5, %s2439_s22  ;;  %s751_s15 = scalar_lea.vmem %s3448_s14, %s3074_s24 }
  0x2c   : > { %s3135_s21 = scalar_lea.vmem [#allocation4], %s3492_s16  ;;  %s3493_s5 = sld [smem:[#allocation9_spill]] }
  0x2d   : > { %s3100_s0 = scalar_lea.vmem %s3491_s7, %s2439_s22  ;;  %s2442_s7 = sshll.u32 %s3074_s24, 6 }
  0x2e   : > { %s3127_s1 = scalar_lea.vmem %s3447_s13, %s2442_s7 }
  0x32   : > { %p2372_p0 = scmp.ne.s32.totalorder %s3493_s5, 0 }
  0x34   : > { %756 = sbr.rel (%p2372_p0) target bundleno = 60 (0x3c), region = 92 }
  0x39   : > { %v757_v0 = vld [vmem:[%s706_s28] sm:$0xff]  ;;  %vm760_vm0 = vcmask 261120   ;;  %v758_v1 = vld [vmem:[%s706_s28 + $0x8] sm:$0xff]  ;;  %v759_v2 = vld [vmem:[%s706_s28 + $0x10] sm:$0xff] }
  0x3a   : > { %761 = vst.msk [vmem:[#allocation2] sm:$0xff] %vm760_vm0, %v757_v0  ;;  %762 = vst.msk [vmem:[#allocation2 + $0x8] sm:$0xff] %vm760_vm0, %v758_v1 }
  0x3b   : > { %763 = vst.msk [vmem:[#allocation2 + $0x10] sm:$0xff] %vm760_vm0, %v759_v2 }
  0x3c PF: > { %vm769_vm1 = vcmask 261120   ;;  %v2714_v24 = vld [vmem:[%s3091_s2 + $0x8] sm:$0xff]   ;;  %v2715_v25 = vld [vmem:[%s3091_s2] sm:$0xff]   ;;  %s3494_s28 = sld [smem:[#allocation22_spill]]  ;;  %s3496_s19 = scalar_lea.vmem %s3438_s4, %s3074_s24  ;;  %vm916_vm2 = vcmask 64512   ;;  %vm989_vm3 = vcmask 195584  }
  0x3d   : > { %2509 = vmatprep.subr.bf16.mxu0 %v2714_v24  ;;  %v2374_v43 = vld [vmem:[%s3496_s19] ss:$0 sm:$0xff]  ;;  %s3497_s17 = scalar_lea.vmem %s3440_s6, %s3074_s24  ;;  %s2896_s26 = smov 96   ;;  %vm1036_vm4 = vcmask 1043456   ;;  %vm1101_vm5 = vcmask 60416   ;;  %vm1295_vm6 = vcmask 126016  }
  0x3e   : > { %2510 = vmatpush3.bf16.msra.mxu0 %v2714_v24  ;;  %v2375_v51 = vld [vmem:[%s3497_s17] ss:$0 sm:$0xff]  ;;  %s3498_s2 = sld [smem:[#allocation20_spill]]  ;;  %s2897_s7 = smov 64   ;;  %vm1489_vm7 = vcmask 191616   ;;  %vm1683_vm8 = vcmask 257216  }
  0x3f   : > { %2511 = vmatprep.subr.bf16.mxu0 %v2715_v25  ;;  %s2900_s27 = smov 56   ;;  %s2901_s3 = smov 80  }
  0x40   : > { %s2902_s19 = smov 112   ;;  %s2903_s29 = smov 48  }
  0x41   : > { %v3138_v3 = vld [vmem:[#allocation2] sm:$0xff]  ;;  %v3142_v5 = vld [vmem:[#allocation2 + $0x8] sm:$0xff]  ;;  %s2904_s20 = smov 72   ;;  %s2905_s17 = smov 104  }
  0x42   : > { %v3140_v4 = vld [vmem:[#allocation2 + $0x10] sm:$0xff]  ;;  %v770_v6 = vsel %vm769_vm1, %v3138_v3, 0.0  ;;  %v773_v8 = vsel %vm769_vm1, %v3142_v5, 0.0  ;;  %2512 = vmatpush3.bf16.msra.mxu0 %v2715_v25  ;;  %s3495_s22 = scalar_lea.vmem %s3494_s28, %s3074_s24  ;;  %s2898_s28 = smov 120  }
  0x43   : > { %v776_v7 = vsel %vm769_vm1, %v3140_v4, 0.0  ;;  %771 = vadd.xlane.f32.xlu0 %v770_v6  ;;  %v2373_v37 = vld [vmem:[%s3495_s22] ss:$0 sm:$0xff]  ;;  %s2899_s22 = smov 88   ;;  %s2907_s16 = smov 8  }
  0x44   : > { %777 = vadd.xlane.f32.xlu1 %v776_v7  ;;  %s2908_s5 = smov 16  }
  0x47   : > { %774 = vadd.xlane.f32.xlu0 %v773_v8  ;;  %v3192_v8 = vld [vmem:[%s3498_s2] ss:$0 sm:$0xff]  ;;  %s2909_s2 = smov 24  }
  0xcc   : > { %v772_v9 = vpop.xlane.xlu0 %771 }
  0xcd   : > { %v778_v10 = vpop.xlane.xlu1 %777  ;;  %v780_v11 = vmul.f32 0.03125, %v772_v9 }
  0xce   : > { %v782_v12 = vmul.f32 0.03125, %v778_v10 }
  0xcf   : > { %v783_v13 = vsub.f32 %v3138_v3, %v780_v11 }
  0xd0   : > { %v785_v14 = vsub.f32 %v3140_v4, %v782_v12  ;;  %v775_v15 = vpop.xlane.xlu0 %774 }
  0xd1   : > { %v781_v16 = vmul.f32 0.03125, %v775_v15  ;;  %v786_v17 = vmul.f32 %v783_v13, %v783_v13 }
  0xd2   : > { %v788_v18 = vmul.f32 %v785_v14, %v785_v14 }
  0xd3   : > { %v784_v19 = vsub.f32 %v3142_v5, %v781_v16  ;;  %v789_v20 = vsel %vm769_vm1, %v786_v17, 0.0 }
  0xd4   : > { %790 = vadd.xlane.f32.xlu1 %v789_v20  ;;  %v795_v21 = vsel %vm769_vm1, %v788_v18, 0.0 }
  0xd5   : > { %v787_v22 = vmul.f32 %v784_v19, %v784_v19 }
  0xd7   : > { %v792_v23 = vsel %vm769_vm1, %v787_v22, 0.0 }
  0xd8   : > { %796 = vadd.xlane.f32.xlu1 %v795_v21  ;;  %793 = vadd.xlane.f32.xlu0 %v792_v23 }
 0x15d   : > { %v791_v26 = vpop.xlane.xlu1 %790 }
 0x15e   : > { %v798_v27 = vmul.f32 0.03125, %v791_v26 }
 0x160   : > { %v801_v28 = vadd.f32 1e-05, %v798_v27 }
 0x161   : > { %v797_v29 = vpop.xlane.xlu1 %796  ;;  %v794_v30 = vpop.xlane.xlu0 %793 }
 0x162   : > { %2730 = vrsqrt.f32 %v801_v28  ;;  %v800_v31 = vmul.f32 0.03125, %v797_v29  ;;  %v799_v32 = vmul.f32 0.03125, %v794_v30 }
 0x164   : > { %v803_v33 = vadd.f32 1e-05, %v800_v31  ;;  %v802_v34 = vadd.f32 1e-05, %v799_v32 }
 0x166   : > { %2732 = vrsqrt.f32 %v803_v33 }
 0x167   : > { %2734 = vrsqrt.f32 %v802_v34 }
 0x16f   : > { %v2731_v35 = vpop.eup %2730 }
 0x170   : > { %v807_v36 = vmul.f32 %v2731_v35, %v783_v13 }
 0x172   : > { %v816_v42 = vmul.f32 %v2373_v37, %v807_v36 }
 0x173   : > { %v2733_v38 = vpop.eup %2732 }
 0x174   : > { %v2735_v39 = vpop.eup %2734  ;;  %v809_v40 = vmul.f32 %v2733_v38, %v785_v14  ;;  %v825_v47 = vadd.f32 %v2374_v43, %v816_v42 }
 0x175   : > { %v808_v41 = vmul.f32 %v2735_v39, %v784_v19 }
 0x176   : > { %v818_v44 = vmul.f32 %v2373_v37, %v809_v40 }
 0x177   : > { %v817_v45 = vmul.f32 %v2373_v37, %v808_v41 }
 0x178   : > { %v827_v46 = vadd.f32 %v2374_v43, %v818_v44 }
 0x179   : > { %v826_v48 = vadd.f32 %v2374_v43, %v817_v45 }
 0x17a   : > { %v829_v49 = vpack.c.bf16 %v827_v46, %v827_v46 }
 0x17b   : > { %v828_v50 = vpack.c.bf16 %v826_v48, %v825_v47 }
 0x17d   : > { %2513 = vmatprep.mubr.msk.bf16.mxu0 %vm769_vm1, %v828_v50 }
 0x17e   : > { %2514 = vmatmul.mubr.msk.bf16.vlgmr.msra.gmra.mxu0 %vm769_vm1, %v829_v49 }
 0x23e   : > { %v2515_v52 = vpop.f32.mrf.mxu0 }
 0x23f   : > { %v902_v53 = vadd.f32 %v2515_v52, %v2375_v51 }
 0x240   : > { %v893_v54 = vpop.f32.mrf.mxu0 }
 0x241   : > { %v3175_v55 = vpack.c.bf16 %v902_v53, %v902_v53  ;;  %v894_v58 = vadd.f32 %v2375_v51, %v893_v54 }
 0x242   : > { %v2516_v56 = vpop.f32.mrf.mxu0 }
 0x243   : > { %914 = vrot.lane.b32.xlu0 %v3175_v55, %s2896_s26 }
 0x244   : > { %v896_v57 = vpop.f32.mrf.mxu0 }
 0x245   : > { %v897_v59 = vadd.f32 %v2375_v51, %v896_v57 }
 0x247   : > { %v3178_v60 = vpack.c.bf16 %v897_v59, %v894_v58 }
 0x249   : > { %912 = vrot.lane.b32.xlu1 %v3178_v60, %s2896_s26  ;;  %2521 = vmatprep.mubr.msk.bf16.mxu0 %vm916_vm2, %v3178_v60  ;;  %s2906_s26 = smov 40  }
 0x2b5   : > { %v915_v61 = vpop.permute.xlu0 %914 }
 0x2b6   : > { %v927_v62 = vsel %vm916_vm2, %v915_v61, 0  ;;  %2617 = vmatprep.subr.msk.bf16.mxu0 %vm916_vm2, %v915_v61 }
 0x2b7   : > { %2518 = vmatpush3.bf16.xpose.msra.mxu0 %v927_v62 }
 0x2bb   : > { %v913_v63 = vpop.permute.xlu1 %912 }
 0x2bc   : > { %2618 = vmatprep.subr.msk.bf16.mxu0 %vm916_vm2, %v913_v63  ;;  %v924_v0 = vsel %vm916_vm2, %v913_v63, 0 }
 0x2bf   : > { %2520 = vmatpush3.bf16.xpose.msra.mxu0 %v924_v0 }
 0x2c6   : > { %2522 = vmatmul.mubr.msk.bf16.vlgmr.msra.gmra.mxu0 %vm916_vm2, %v3175_v55 }
 0x386   : > { %v2523_v1 = vpop.f32.mrf.mxu0 }
 0x387   : > { %v979_v11 = vmul.f32 0.35355338, %v2523_v1 }
 0x388   : > { %v963_v2 = vpop.f32.mrf.mxu0 }
 0x389   : > { %v977_v6 = vmul.f32 0.35355338, %v963_v2  ;;  %v988_v16 = vadd.f32 %v3192_v8, %v979_v11 }
 0x38a   : > { %v2524_v7 = vpop.f32.mrf.mxu0 }
 0x38b   : > { %v986_v9 = vadd.f32 %v3192_v8, %v977_v6  ;;  %v996_v17 = vsel %vm989_vm3, %v988_v16, -inf }
 0x38c   : > { %v966_v10 = vpop.f32.mrf.mxu0 }
 0x38d   : > { %v978_v12 = vmul.f32 0.35355338, %v966_v10  ;;  %v990_v13 = vsel %vm989_vm3, %v986_v9, -inf }
 0x38e   : > { %991 = vmax.xlane.f32.xlu1 %v990_v13 }
 0x38f   : > { %v987_v14 = vadd.f32 %v3192_v8, %v978_v12 }
 0x391   : > { %v993_v15 = vsel %vm989_vm3, %v987_v14, -inf }
 0x392   : > { %994 = vmax.xlane.f32.xlu0 %v993_v15 }
 0x396   : > { %997 = vmax.xlane.f32.xlu0 %v996_v17 }
 0x417   : > { %v992_v18 = vpop.xlane.xlu1 %991 }
 0x418   : > { %v999_v21 = vsub.f32 %v986_v9, %v992_v18 }
 0x41a   : > { %v1002_v25 = vmul.f32 1.442695, %v999_v21 }
 0x41b   : > { %v995_v19 = vpop.xlane.xlu0 %994 }
 0x41c   : > { %v1000_v20 = vsub.f32 %v987_v14, %v995_v19 }
 0x41e   : > { %v1004_v22 = vmul.f32 1.442695, %v1000_v20 }
 0x41f   : > { %v998_v23 = vpop.xlane.xlu0 %997 }
 0x420   : > { %2736 = vpow2.f32 %v1004_v22  ;;  %v1001_v24 = vsub.f32 %v988_v16, %v998_v23 }
 0x422   : > { %v1006_v26 = vmul.f32 1.442695, %v1001_v24 }
 0x424   : > { %2738 = vpow2.f32 %v1006_v26 }
 0x425   : > { %2740 = vpow2.f32 %v1002_v25 }
 0x42d   : > { %v2737_v27 = vpop.eup %2736 }
 0x42e   : > { %v1011_v28 = vsel %vm989_vm3, %v2737_v27, 0.0 }
 0x42f   : > { %1012 = vadd.xlane.f32.xlu0 %v1011_v28 }
 0x431   : > { %v2739_v29 = vpop.eup %2738 }
 0x432   : > { %v1014_v30 = vsel %vm989_vm3, %v2739_v29, 0.0  ;;  %v2741_v31 = vpop.eup %2740 }
 0x433   : > { %1015 = vadd.xlane.f32.xlu1 %v1014_v30  ;;  %v1008_v32 = vsel %vm989_vm3, %v2741_v31, 0.0 }
 0x437   : > { %1009 = vadd.xlane.f32.xlu1 %v1008_v32 }
 0x445   : > { %1027 = vrot.lane.b32.xlu0 %v3175_v55, %s2897_s7 }
 0x448   : > { %1025 = vrot.lane.b32.xlu1 %v3178_v60, %s2897_s7 }
 0x449   : > { %1105 = vrot.lane.b32.xlu0 %v3178_v60, %s2898_s28 }
 0x44c   : > { %1111 = vrot.lane.b32.xlu1 %v3175_v55, %s2899_s22 }
 0x450   : > { %1109 = vrot.lane.b32.xlu1 %v3178_v60, %s2899_s22 }
 0x454   : > { %1107 = vrot.lane.b32.xlu1 %v3175_v55, %s2898_s28  ;;  %s3499_s28 = scalar_lea.vmem %s3442_s8, %s3074_s24 }
 0x4b8   : > { %v1013_v33 = vpop.xlane.xlu0 %1012 }
 0x4bc   : > { %v1016_v34 = vpop.xlane.xlu1 %1015  ;;  %v1028_v35 = vpop.permute.xlu0 %1027 }
 0x4bd   : > { %v1038_v36 = vsel %vm1036_vm4, %v1028_v35, 0  ;;  %2619 = vmatprep.subr.msk.bf16.mxu0 %vm1036_vm4, %v1028_v35  ;;  %2742 = vrcp.f32 %v1016_v34 }
 0x4be   : > { %2526 = vmatpush3.bf16.msra.mxu0 %v1038_v36  ;;  %2744 = vrcp.f32 %v1013_v33 }
 0x4c0   : > { %v1010_v37 = vpop.xlane.xlu1 %1009  ;;  %v1106_v48 = vpop.permute.xlu0 %1105 }
 0x4c1   : > { %2746 = vrcp.f32 %v1010_v37 }
 0x4c4   : > { %v1026_v38 = vpop.permute.xlu1 %1025 }
 0x4c5   : > { %2527 = vmatprep.subr.bf16.mxu0 %v1026_v38 }
 0x4c6   : > { %2528 = vmatpush3.bf16.msra.mxu0 %v1026_v38 }
 0x4c8   : > { %v1112_v39 = vpop.permute.xlu1 %1111 }
 0x4c9   : > { %2620 = vmatprep.subr.msk.bf16.mxu0 %vm916_vm2, %v1112_v39  ;;  %v1123_v49 = vsel %vm916_vm2, %v1112_v39, 0 }
 0x4ca   : > { %v2743_v40 = vpop.eup %2742 }
 0x4cb   : > { %v2745_v41 = vpop.eup %2744  ;;  %v1022_v43 = vmul.f32 %v2743_v40, %v2739_v29 }
 0x4cc   : > { %v1021_v45 = vmul.f32 %v2745_v41, %v2737_v27  ;;  %v1110_v50 = vpop.permute.xlu1 %1109 }
 0x4cd   : > { %v1024_v47 = vpack.c.bf16 %v1022_v43, %v1022_v43  ;;  %v1120_v51 = vsel %vm916_vm2, %v1110_v50, 0 }
 0x4ce   : > { %v2747_v42 = vpop.eup %2746 }
 0x4cf   : > { %v1020_v44 = vmul.f32 %v2747_v42, %v2741_v31 }
 0x4d0   : > { %v1108_v52 = vpop.permute.xlu1 %1107 }
 0x4d1   : > { %v1023_v46 = vpack.c.bf16 %v1021_v45, %v1020_v44 }
 0x4d3   : > { %2529 = vmatprep.mubr.msk.bf16.mxu0 %vm989_vm3, %v1023_v46 }
 0x4d4   : > { %2530 = vmatmul.mubr.msk.bf16.vlgmr.msra.gmra.mxu0 %vm989_vm3, %v1024_v47 }
 0x4d5   : > { %2534 = vmatpush3.bf16.xpose.msra.mxu0 %v1123_v49  ;;  %2537 = vmatprep.mubr.msk.bf16.mxu0 %vm916_vm2, %v1106_v48 }
 0x4d6   : > { %2621 = vmatprep.subr.msk.bf16.mxu0 %vm916_vm2, %v1110_v50 }
 0x4dd   : > { %2536 = vmatpush3.bf16.xpose.msra.mxu0 %v1120_v51 }
 0x4e4   : > { %2538 = vmatmul.mubr.msk.bf16.vlgmr.msra.gmra.mxu0 %vm916_vm2, %v1108_v52 }
 0x594   : > { %v2531_v53 = vpop.f32.mrf.mxu0 }
 0x595   : > { %v2445_v54 = vpack.c.bf16 %v2531_v53, %v2531_v53 }
 0x596   : > { %v1074_v56 = vpop.f32.mrf.mxu0 }
 0x597   : > { %1104 = vst.msk [vmem:[#allocation3 + $0x8] sm:$0xf] %vm1101_vm5, %v2445_v54  ;;  %v2443_v57 = vpack.c.bf16 %v1074_v56, %v1074_v56 }
 0x598   : > { %v2532_v58 = vpop.f32.mrf.mxu0 }
 0x599   : > { %1102 = vst.msk [vmem:[#allocation3] sm:$0xf] %vm1101_vm5, %v2443_v57 }
 0x59a   : > { %v1077_v59 = vpop.f32.mrf.mxu0 }
 0x59b   : > { %v2444_v61 = vpack.c.bf16 %v1077_v59, %v1077_v59 }
 0x59d   : > { %1103 = vst.msk [vmem:[#allocation3 + $0x4] sm:$0xf] %vm1101_vm5, %v2444_v61 }
 0x5a4   : > { %v2539_v62 = vpop.f32.mrf.mxu0 }
 0x5a5   : > { %v1175_v0 = vmul.f32 0.35355338, %v2539_v62 }
 0x5a6   : > { %v1159_v63 = vpop.f32.mrf.mxu0 }
 0x5a7   : > { %v1173_v1 = vmul.f32 0.35355338, %v1159_v63  ;;  %v1178_v11 = vadd.f32 %v3192_v8, %v1175_v0 }
 0x5a8   : > { %v2540_v2 = vpop.f32.mrf.mxu0 }
 0x5a9   : > { %v1176_v6 = vadd.f32 %v3192_v8, %v1173_v1  ;;  %v1185_v13 = vsel %vm989_vm3, %v1178_v11, -inf }
 0x5aa   : > { %v1162_v7 = vpop.f32.mrf.mxu0 }
 0x5ab   : > { %v1174_v9 = vmul.f32 0.35355338, %v1162_v7  ;;  %v1179_v10 = vsel %vm989_vm3, %v1176_v6, -inf }
 0x5ac   : > { %1180 = vmax.xlane.f32.xlu0 %v1179_v10 }
 0x5ad   : > { %v1177_v12 = vadd.f32 %v3192_v8, %v1174_v9 }
 0x5af   : > { %v1182_v14 = vsel %vm989_vm3, %v1177_v12, -inf }
 0x5b0   : > { %1186 = vmax.xlane.f32.xlu0 %v1185_v13  ;;  %1183 = vmax.xlane.f32.xlu1 %v1182_v14 }
 0x635   : > { %v1181_v15 = vpop.xlane.xlu0 %1180 }
 0x636   : > { %v1188_v16 = vsub.f32 %v1176_v6, %v1181_v15 }
 0x638   : > { %v1191_v17 = vmul.f32 1.442695, %v1188_v16 }
 0x639   : > { %v1187_v18 = vpop.xlane.xlu0 %1186  ;;  %v1184_v19 = vpop.xlane.xlu1 %1183 }
 0x63a   : > { %2748 = vpow2.f32 %v1191_v17  ;;  %v1190_v20 = vsub.f32 %v1178_v11, %v1187_v18  ;;  %v1189_v21 = vsub.f32 %v1177_v12, %v1184_v19 }
 0x63c   : > { %v1195_v22 = vmul.f32 1.442695, %v1190_v20  ;;  %v1193_v23 = vmul.f32 1.442695, %v1189_v21 }
 0x63e   : > { %2750 = vpow2.f32 %v1195_v22 }
 0x63f   : > { %2752 = vpow2.f32 %v1193_v23 }
 0x647   : > { %v2749_v24 = vpop.eup %2748 }
 0x648   : > { %v1197_v25 = vsel %vm989_vm3, %v2749_v24, 0.0 }
 0x649   : > { %1198 = vadd.xlane.f32.xlu0 %v1197_v25 }
 0x64b   : > { %v2751_v26 = vpop.eup %2750 }
 0x64c   : > { %v2753_v27 = vpop.eup %2752  ;;  %v1203_v28 = vsel %vm989_vm3, %v2751_v26, 0.0 }
 0x64d   : > { %1204 = vadd.xlane.f32.xlu1 %v1203_v28  ;;  %v1200_v29 = vsel %vm989_vm3, %v2753_v27, 0.0 }
 0x64e   : > { %1201 = vadd.xlane.f32.xlu0 %v1200_v29 }
 0x65e   : > { %1214 = vrot.lane.b32.xlu1 %v3178_v60, %s2900_s27 }
 0x662   : > { %1305 = vrot.lane.b32.xlu1 %v3175_v55, %s2901_s3 }
 0x664   : > { %1216 = vrot.lane.b32.xlu0 %v3175_v55, %s2900_s27 }
 0x666   : > { %1303 = vrot.lane.b32.xlu1 %v3178_v60, %s2901_s3 }
 0x668   : > { %1299 = vrot.lane.b32.xlu0 %v3178_v60, %s2902_s19 }
 0x66a   : > { %1301 = vrot.lane.b32.xlu1 %v3175_v55, %s2902_s19  ;;  %s3500_s19 = scalar_lea.vmem %s3444_s10, %s3074_s24  ;;  %s3501_s24 = sld [smem:[#allocation9_spill]] }
 0x670   : > { %p2432_p1 = scmp.ne.s32.totalorder %s3501_s24, 1 }
 0x671   : > { %s3504_s7 = sld [smem:[#allocation26_spill]] (!%p2432_p1) }
 0x6d2   : > { %v1199_v30 = vpop.xlane.xlu0 %1198 }
 0x6d3   : > { %2754 = vrcp.f32 %v1199_v30 }
 0x6d6   : > { %v1205_v31 = vpop.xlane.xlu1 %1204 }
 0x6d7   : > { %v1202_v32 = vpop.xlane.xlu0 %1201  ;;  %2756 = vrcp.f32 %v1205_v31 }
 0x6d8   : > { %2758 = vrcp.f32 %v1202_v32 }
 0x6da   : > { %v1215_v34 = vpop.permute.xlu1 %1214 }
 0x6db   : > { %v1217_v33 = vpop.permute.xlu0 %1216 }
 0x6dc   : > { %2622 = vmatprep.subr.msk.bf16.mxu1 %vm1036_vm4, %v1217_v33  ;;  %v1226_v35 = vsel %vm1036_vm4, %v1217_v33, 0 }
 0x6dd   : > { %2542 = vmatpush3.bf16.msra.mxu1 %v1226_v35 }
 0x6de   : > { %2543 = vmatprep.subr.bf16.mxu1 %v1215_v34  ;;  %v1306_v36 = vpop.permute.xlu1 %1305 }
 0x6df   : > { %v1300_v45 = vpop.permute.xlu0 %1299  ;;  %v1317_v46 = vsel %vm916_vm2, %v1306_v36, 0 }
 0x6e0   : > { %v2755_v37 = vpop.eup %2754 }
 0x6e1   : > { %2544 = vmatpush3.bf16.msra.mxu1 %v1215_v34  ;;  %v1209_v41 = vmul.f32 %v2755_v37, %v2749_v24 }
 0x6e2   : > { %2623 = vmatprep.subr.msk.bf16.mxu1 %vm916_vm2, %v1306_v36  ;;  %v1304_v47 = vpop.permute.xlu1 %1303 }
 0x6e3   : > { %v1314_v48 = vsel %vm916_vm2, %v1304_v47, 0 }
 0x6e4   : > { %v2757_v38 = vpop.eup %2756 }
 0x6e5   : > { %v2759_v39 = vpop.eup %2758  ;;  %v1211_v40 = vmul.f32 %v2757_v38, %v2751_v26 }
 0x6e6   : > { %v1210_v42 = vmul.f32 %v2759_v39, %v2753_v27  ;;  %v1302_v49 = vpop.permute.xlu1 %1301 }
 0x6e7   : > { %v1213_v43 = vpack.c.bf16 %v1211_v40, %v1211_v40 }
 0x6e8   : > { %v1212_v44 = vpack.c.bf16 %v1210_v42, %v1209_v41 }
 0x6ea   : > { %2545 = vmatprep.mubr.msk.bf16.mxu1 %vm989_vm3, %v1212_v44 }
 0x6eb   : > { %2546 = vmatmul.mubr.msk.bf16.vlgmr.msra.gmra.mxu1 %vm989_vm3, %v1213_v43 }
 0x6ec   : > { %2550 = vmatpush3.bf16.xpose.msra.mxu1 %v1317_v46  ;;  %2553 = vmatprep.mubr.msk.bf16.mxu1 %vm916_vm2, %v1300_v45 }
 0x6ed   : > { %2624 = vmatprep.subr.msk.bf16.mxu1 %vm916_vm2, %v1304_v47 }
 0x6f4   : > { %2552 = vmatpush3.bf16.xpose.msra.mxu1 %v1314_v48 }
 0x6fb   : > { %2554 = vmatmul.mubr.msk.bf16.vlgmr.msra.gmra.mxu1 %vm916_vm2, %v1302_v49 }
 0x7ab   : > { %v3244_v50 = vpop.f32.mrf.mxu1 }
 0x7ad   : > { %v3246_v51 = vpop.f32.mrf.mxu1 }
 0x7af   : > { %v2548_v52 = vpop.f32.mrf.mxu1 }
 0x7b1   : > { %v3248_v53 = vpop.f32.mrf.mxu1 }
 0x7bb   : > { %v2555_v54 = vpop.f32.mrf.mxu1 }
 0x7bc   : > { %v1369_v57 = vmul.f32 0.35355338, %v2555_v54 }
 0x7bd   : > { %v1353_v56 = vpop.f32.mrf.mxu1 }
 0x7be   : > { %v1367_v58 = vmul.f32 0.35355338, %v1353_v56  ;;  %v1372_v1 = vadd.f32 %v3192_v8, %v1369_v57 }
 0x7bf   : > { %v2556_v59 = vpop.f32.mrf.mxu1 }
 0x7c0   : > { %v1370_v61 = vadd.f32 %v3192_v8, %v1367_v58  ;;  %v1379_v6 = vsel %vm989_vm3, %v1372_v1, -inf }
 0x7c1   : > { %v1356_v62 = vpop.f32.mrf.mxu1 }
 0x7c2   : > { %v1368_v63 = vmul.f32 0.35355338, %v1356_v62  ;;  %v1373_v0 = vsel %vm989_vm3, %v1370_v61, -inf }
 0x7c3   : > { %1374 = vmax.xlane.f32.xlu0 %v1373_v0 }
 0x7c4   : > { %v1371_v2 = vadd.f32 %v3192_v8, %v1368_v63 }
 0x7c6   : > { %v1376_v7 = vsel %vm989_vm3, %v1371_v2, -inf }
 0x7c7   : > { %1380 = vmax.xlane.f32.xlu0 %v1379_v6  ;;  %1377 = vmax.xlane.f32.xlu1 %v1376_v7 }
 0x84c   : > { %v1375_v9 = vpop.xlane.xlu0 %1374 }
 0x84d   : > { %v1382_v10 = vsub.f32 %v1370_v61, %v1375_v9 }
 0x84f   : > { %v1385_v11 = vmul.f32 1.442695, %v1382_v10 }
 0x850   : > { %v1381_v12 = vpop.xlane.xlu0 %1380  ;;  %v1378_v13 = vpop.xlane.xlu1 %1377 }
 0x851   : > { %2760 = vpow2.f32 %v1385_v11  ;;  %v1384_v14 = vsub.f32 %v1372_v1, %v1381_v12  ;;  %v1383_v15 = vsub.f32 %v1371_v2, %v1378_v13 }
 0x853   : > { %v1389_v16 = vmul.f32 1.442695, %v1384_v14  ;;  %v1387_v17 = vmul.f32 1.442695, %v1383_v15 }
 0x855   : > { %2762 = vpow2.f32 %v1389_v16 }
 0x856   : > { %2764 = vpow2.f32 %v1387_v17 }
 0x85e   : > { %v2761_v18 = vpop.eup %2760 }
 0x85f   : > { %v1391_v19 = vsel %vm989_vm3, %v2761_v18, 0.0 }
 0x860   : > { %1392 = vadd.xlane.f32.xlu0 %v1391_v19 }
 0x862   : > { %v2763_v20 = vpop.eup %2762 }
 0x863   : > { %v2765_v21 = vpop.eup %2764  ;;  %v1397_v22 = vsel %vm989_vm3, %v2763_v20, 0.0 }
 0x864   : > { %1398 = vadd.xlane.f32.xlu1 %v1397_v22  ;;  %v1394_v23 = vsel %vm989_vm3, %v2765_v21, 0.0  ;;  %v2448_v22 = vpack.c.bf16 %v3244_v50, %v3244_v50 }
 0x865   : > { %1395 = vadd.xlane.f32.xlu0 %v1394_v23 }
 0x875   : > { %1408 = vrot.lane.b32.xlu1 %v3178_v60, %s2903_s29 }
 0x879   : > { %1499 = vrot.lane.b32.xlu1 %v3175_v55, %s2904_s20 }
 0x87b   : > { %1410 = vrot.lane.b32.xlu0 %v3175_v55, %s2903_s29 }
 0x87d   : > { %1497 = vrot.lane.b32.xlu1 %v3178_v60, %s2904_s20 }
 0x87f   : > { %1493 = vrot.lane.b32.xlu0 %v3178_v60, %s2905_s17 }
 0x881   : > { %1495 = vrot.lane.b32.xlu1 %v3175_v55, %s2905_s17  ;;  %s3502_s17 = sld [smem:[#allocation21_spill]] (!%p2432_p1) }
 0x8e9   : > { %v1393_v24 = vpop.xlane.xlu0 %1392 }
 0x8ea   : > { %2766 = vrcp.f32 %v1393_v24 }
 0x8ed   : > { %v1399_v25 = vpop.xlane.xlu1 %1398 }
 0x8ee   : > { %v1396_v26 = vpop.xlane.xlu0 %1395  ;;  %2768 = vrcp.f32 %v1399_v25 }
 0x8ef   : > { %2770 = vrcp.f32 %v1396_v26 }
 0x8f1   : > { %v1409_v28 = vpop.permute.xlu1 %1408 }
 0x8f2   : > { %v1411_v27 = vpop.permute.xlu0 %1410 }
 0x8f3   : > { %v1420_v29 = vsel %vm1036_vm4, %v1411_v27, 0  ;;  %2625 = vmatprep.subr.msk.bf16.mxu0 %vm1036_vm4, %v1411_v27 }
 0x8f4   : > { %2558 = vmatpush3.bf16.msra.mxu0 %v1420_v29 }
 0x8f5   : > { %2559 = vmatprep.subr.bf16.mxu0 %v1409_v28  ;;  %v1500_v30 = vpop.permute.xlu1 %1499 }
 0x8f6   : > { %v1494_v39 = vpop.permute.xlu0 %1493  ;;  %v1511_v40 = vsel %vm916_vm2, %v1500_v30, 0 }
 0x8f7   : > { %v2767_v31 = vpop.eup %2766 }
 0x8f8   : > { %2560 = vmatpush3.bf16.msra.mxu0 %v1409_v28  ;;  %v1403_v35 = vmul.f32 %v2767_v31, %v2761_v18 }
 0x8f9   : > { %2626 = vmatprep.subr.msk.bf16.mxu0 %vm916_vm2, %v1500_v30  ;;  %v1498_v41 = vpop.permute.xlu1 %1497 }
 0x8fa   : > { %v1508_v42 = vsel %vm916_vm2, %v1498_v41, 0 }
 0x8fb   : > { %v2769_v32 = vpop.eup %2768 }
 0x8fc   : > { %v2771_v33 = vpop.eup %2770  ;;  %v1405_v34 = vmul.f32 %v2769_v32, %v2763_v20  ;;  %v2446_v20 = vpack.c.bf16 %v3246_v51, %v3246_v51 }
 0x8fd   : > { %v1404_v36 = vmul.f32 %v2771_v33, %v2765_v21  ;;  %v1496_v43 = vpop.permute.xlu1 %1495  ;;  %v2447_v21 = vpack.c.bf16 %v3248_v53, %v3248_v53 }
 0x8fe   : > { %v1407_v37 = vpack.c.bf16 %v1405_v34, %v1405_v34 }
 0x8ff   : > { %v1406_v38 = vpack.c.bf16 %v1404_v36, %v1403_v35 }
 0x901   : > { %2561 = vmatprep.mubr.msk.bf16.mxu0 %vm989_vm3, %v1406_v38 }
 0x902   : > { %2562 = vmatmul.mubr.msk.bf16.vlgmr.msra.gmra.mxu0 %vm989_vm3, %v1407_v37 }
 0x903   : > { %2566 = vmatpush3.bf16.xpose.msra.mxu0 %v1511_v40  ;;  %2569 = vmatprep.mubr.msk.bf16.mxu0 %vm916_vm2, %v1494_v39 }
 0x904   : > { %2627 = vmatprep.subr.msk.bf16.mxu0 %vm916_vm2, %v1498_v41  ;;  %v2716_v41 = vld [vmem:[%s3100_s0 + $0x8] sm:$0xff]  }
 0x90b   : > { %2568 = vmatpush3.bf16.xpose.msra.mxu0 %v1508_v42  ;;  %v2717_v42 = vld [vmem:[%s3100_s0] sm:$0xff]  }
 0x912   : > { %2570 = vmatmul.mubr.msk.bf16.vlgmr.msra.gmra.mxu0 %vm916_vm2, %v1496_v43 }
 0x9c2   : > { %v2563_v44 = vpop.f32.mrf.mxu0 }
 0x9c4   : > { %v1456_v45 = vpop.f32.mrf.mxu0 }
 0x9c5   : > { %v2449_v23 = vpack.c.bf16 %v1456_v45, %v1456_v45 }
 0x9c6   : > { %v2564_v46 = vpop.f32.mrf.mxu0 }
 0x9c8   : > { %v1459_v47 = vpop.f32.mrf.mxu0 }
 0x9c9   : > { %v2450_v24 = vpack.c.bf16 %v1459_v47, %v1459_v47 }
 0x9d2   : > { %v2571_v48 = vpop.f32.mrf.mxu0 }
 0x9d3   : > { %v1563_v52 = vmul.f32 0.35355338, %v2571_v48 }
 0x9d4   : > { %v1547_v49 = vpop.f32.mrf.mxu0 }
 0x9d5   : > { %v1561_v54 = vmul.f32 0.35355338, %v1547_v49  ;;  %v1566_v62 = vadd.f32 %v3192_v8, %v1563_v52 }
 0x9d6   : > { %v2572_v56 = vpop.f32.mrf.mxu0 }
 0x9d7   : > { %v1564_v57 = vadd.f32 %v3192_v8, %v1561_v54  ;;  %v1573_v0 = vsel %vm989_vm3, %v1566_v62, -inf }
 0x9d8   : > { %v1550_v58 = vpop.f32.mrf.mxu0 }
 0x9d9   : > { %v1562_v59 = vmul.f32 0.35355338, %v1550_v58  ;;  %v1567_v61 = vsel %vm989_vm3, %v1564_v57, -inf }
 0x9da   : > { %1568 = vmax.xlane.f32.xlu0 %v1567_v61 }
 0x9db   : > { %v1565_v63 = vadd.f32 %v3192_v8, %v1562_v59 }
 0x9dd   : > { %v1570_v1 = vsel %vm989_vm3, %v1565_v63, -inf }
 0x9de   : > { %1574 = vmax.xlane.f32.xlu0 %v1573_v0  ;;  %1571 = vmax.xlane.f32.xlu1 %v1570_v1 }
 0xa63   : > { %v1569_v2 = vpop.xlane.xlu0 %1568 }
 0xa64   : > { %v1576_v6 = vsub.f32 %v1564_v57, %v1569_v2 }
 0xa66   : > { %v1579_v7 = vmul.f32 1.442695, %v1576_v6 }
 0xa67   : > { %v1575_v9 = vpop.xlane.xlu0 %1574  ;;  %v1572_v10 = vpop.xlane.xlu1 %1571 }
 0xa68   : > { %2772 = vpow2.f32 %v1579_v7  ;;  %v1578_v11 = vsub.f32 %v1566_v62, %v1575_v9  ;;  %v1577_v12 = vsub.f32 %v1565_v63, %v1572_v10  ;;  %v2415_v63 = vld [vmem:[%s3499_s28] ss:$0 sm:$0xff] }
 0xa6a   : > { %v1583_v13 = vmul.f32 1.442695, %v1578_v11  ;;  %v1581_v14 = vmul.f32 1.442695, %v1577_v12 }
 0xa6c   : > { %2774 = vpow2.f32 %v1583_v13 }
 0xa6d   : > { %2776 = vpow2.f32 %v1581_v14 }
 0xa75   : > { %v2773_v15 = vpop.eup %2772 }
 0xa76   : > { %v1585_v8 = vsel %vm989_vm3, %v2773_v15, 0.0 }
 0xa77   : > { %1586 = vadd.xlane.f32.xlu0 %v1585_v8 }
 0xa79   : > { %v2775_v16 = vpop.eup %2774 }
 0xa7a   : > { %v2777_v17 = vpop.eup %2776  ;;  %v1591_v18 = vsel %vm989_vm3, %v2775_v16, 0.0 }
 0xa7b   : > { %1592 = vadd.xlane.f32.xlu1 %v1591_v18  ;;  %v1588_v19 = vsel %vm989_vm3, %v2777_v17, 0.0 }
 0xa7c   : > { %1589 = vadd.xlane.f32.xlu0 %v1588_v19 }
 0xa8c   : > { %1602 = vrot.lane.b32.xlu1 %v3178_v60, %s2906_s26  ;;  %v2451_v60 = vpack.c.bf16 %v2563_v44, %v2563_v44 }
 0xa90   : > { %1286 = vrot.lane.b32.xlu1 %v2446_v20, %s2907_s16 }
 0xa92   : > { %1604 = vrot.lane.b32.xlu0 %v3175_v55, %s2906_s26 }
 0xa94   : > { %1288 = vrot.lane.b32.xlu1 %v2447_v21, %s2907_s16 }
 0xa96   : > { %1290 = vrot.lane.b32.xlu0 %v2448_v22, %s2907_s16 }
 0xa98   : > { %1480 = vrot.lane.b32.xlu1 %v2449_v23, %s2908_s5 }
 0xa9a   : > { %1482 = vrot.lane.b32.xlu0 %v2450_v24, %s2908_s5 }
 0xa9c   : > { %1484 = vrot.lane.b32.xlu1 %v2451_v60, %s2908_s5  ;;  %v2720_v60 = vld [vmem:[%s3117_s23 + $0x8] sm:$0xff]   ;;  %s3503_s5 = sld [smem:[#allocation25_spill]] (!%p2432_p1) }
 0xa9d   : > { %2589 = vmatprep.subr.bf16.mxu0 %v2720_v60 }
 0xa9e   : > { %2590 = vmatpush3.bf16.msra.mxu0 %v2720_v60  ;;  %v2431_v60 = vld [vmem:[%s751_s15] ss:$0 sm:$0xff] }
 0xb00   : > { %v1587_v51 = vpop.xlane.xlu0 %1586 }
 0xb01   : > { %2778 = vrcp.f32 %v1587_v51  ;;  %v2721_v51 = vld [vmem:[%s3117_s23] sm:$0xff]  }
 0xb02   : > { %2591 = vmatprep.subr.bf16.mxu0 %v2721_v51 }
 0xb03   : > { %2592 = vmatpush3.bf16.msra.mxu0 %v2721_v51 }
 0xb04   : > { %v1593_v25 = vpop.xlane.xlu1 %1592 }
 0xb05   : > { %v1590_v26 = vpop.xlane.xlu0 %1589  ;;  %2780 = vrcp.f32 %v1593_v25 }
 0xb06   : > { %2782 = vrcp.f32 %v1590_v26 }
 0xb08   : > { %v1603_v53 = vpop.permute.xlu1 %1602 }
 0xb09   : > { %v1605_v55 = vpop.permute.xlu0 %1604 }
 0xb0a   : > { %v1614_v27 = vsel %vm1036_vm4, %v1605_v55, 0  ;;  %2628 = vmatprep.subr.msk.bf16.mxu1 %vm1036_vm4, %v1605_v55 }
 0xb0b   : > { %2574 = vmatpush3.bf16.msra.mxu1 %v1614_v27 }
 0xb0c   : > { %2575 = vmatprep.subr.bf16.mxu1 %v1603_v53  ;;  %v1287_v50 = vpop.permute.xlu1 %1286 }
 0xb0d   : > { %v1291_v28 = vpop.permute.xlu0 %1290  ;;  %1296 = vst.msk [vmem:[#allocation3] sm:$0xf] %vm1295_vm6, %v1287_v50 }
 0xb0e   : > { %1298 = vst.msk [vmem:[#allocation3 + $0x8] sm:$0xf] %vm1295_vm6, %v1291_v28  ;;  %v2779_v30 = vpop.eup %2778 }
 0xb0f   : > { %2576 = vmatpush3.bf16.msra.mxu1 %v1603_v53  ;;  %v1597_v36 = vmul.f32 %v2779_v30, %v2773_v15 }
 0xb10   : > { %v1289_v29 = vpop.permute.xlu1 %1288  ;;  %2581 = vmatprep.subr.bf16.mxu1 %v2716_v41 }
 0xb11   : > { %v1483_v31 = vpop.permute.xlu0 %1482  ;;  %1297 = vst.msk [vmem:[#allocation3 + $0x4] sm:$0xf] %vm1295_vm6, %v1289_v29 }
 0xb12   : > { %v2781_v32 = vpop.eup %2780  ;;  %1491 = vst.msk [vmem:[#allocation3 + $0x4] sm:$0xf] %vm1489_vm7, %v1483_v31 }
 0xb13   : > { %v2783_v33 = vpop.eup %2782  ;;  %v1599_v34 = vmul.f32 %v2781_v32, %v2775_v16 }
 0xb14   : > { %v1481_v35 = vpop.permute.xlu1 %1480  ;;  %v1598_v37 = vmul.f32 %v2783_v33, %v2777_v17  ;;  %v2416_v33 = vld [vmem:[%s732_s30] ss:$0 sm:$0xff] }
 0xb15   : > { %1490 = vst.msk [vmem:[#allocation3] sm:$0xf] %vm1489_vm7, %v1481_v35  ;;  %v1601_v38 = vpack.c.bf16 %v1599_v34, %v1599_v34 }
 0xb16   : > { %v1600_v39 = vpack.c.bf16 %v1598_v37, %v1597_v36  ;;  %v2417_v37 = vld [vmem:[%s3500_s19] ss:$0 sm:$0xff] }
 0xb18   : > { %2577 = vmatprep.mubr.msk.bf16.mxu1 %vm989_vm3, %v1600_v39  ;;  %v1485_v40 = vpop.permute.xlu1 %1484 }
 0xb19   : > { %2578 = vmatmul.mubr.msk.bf16.vlgmr.msra.gmra.mxu1 %vm989_vm3, %v1601_v38  ;;  %1492 = vst.msk [vmem:[#allocation3 + $0x8] sm:$0xf] %vm1489_vm7, %v1485_v40 }
 0xb1a   : > { %2582 = vmatpush3.bf16.msra.mxu1 %v2716_v41 }
 0xb1b   : > { %2583 = vmatprep.subr.bf16.mxu1 %v2717_v42 }
 0xb1e   : > { %2584 = vmatpush3.bf16.msra.mxu1 %v2717_v42 }
 0xbd9   : > { %v2579_v43 = vpop.f32.mrf.mxu1 }
 0xbda   : > { %v2454_v48 = vpack.c.bf16 %v2579_v43, %v2579_v43 }
 0xbdb   : > { %v1650_v44 = vpop.f32.mrf.mxu1 }
 0xbdc   : > { %v2452_v45 = vpack.c.bf16 %v1650_v44, %v1650_v44 }
 0xbdd   : > { %v2580_v46 = vpop.f32.mrf.mxu1 }
 0xbde   : > { %1674 = vrot.lane.b32.xlu0 %v2452_v45, %s2909_s2 }
 0xbdf   : > { %v1653_v47 = vpop.f32.mrf.mxu1 }
 0xbe0   : > { %v2453_v49 = vpack.c.bf16 %v1653_v47, %v1653_v47  ;;  %v2722_v47 = vld [vmem:[%s3127_s1 + $0x38] sm:$0xff]  }
 0xbe1   : > { %2597 = vmatprep.subr.bf16.mxu1 %v2722_v47 }
 0xbe2   : > { %1678 = vrot.lane.b32.xlu0 %v2454_v48, %s2909_s2  ;;  %1676 = vrot.lane.b32.xlu1 %v2453_v49, %s2909_s2  ;;  %v2723_v48 = vld [vmem:[%s3127_s1 + $0x30] sm:$0xff]   ;;  %v2724_v49 = vld [vmem:[%s3127_s1 + $0x28] sm:$0xff]  }
 0xc50   : > { %v1675_v52 = vpop.permute.xlu0 %1674 }
 0xc51   : > { %1684 = vst.msk [vmem:[#allocation3] sm:$0xf] %vm1683_vm8, %v1675_v52  ;;  %v2725_v52 = vld [vmem:[%s3127_s1 + $0x20] sm:$0xff]  }
 0xc54   : > { %v1679_v54 = vpop.permute.xlu0 %1678  ;;  %v1677_v56 = vpop.permute.xlu1 %1676 }
 0xc55   : > { %1686 = vst.msk [vmem:[#allocation3 + $0x8] sm:$0xf] %vm1683_vm8, %v1679_v54  ;;  %1685 = vst.msk [vmem:[#allocation3 + $0x4] sm:$0xf] %vm1683_vm8, %v1677_v56  ;;  %v2726_v54 = vld [vmem:[%s3127_s1 + $0x18] sm:$0xff]   ;;  %v2727_v56 = vld [vmem:[%s3127_s1 + $0x10] sm:$0xff]  }
 0xc5c   : > { %v2718_v57 = vld [vmem:[#allocation3] sm:$0xff]   ;;  %v2719_v58 = vld [vmem:[#allocation3 + $0x8] ss:$0 sps:$4 sm:$0xff]  }
 0xc5d   : > { %2585 = vmatprep.mubr.msk.bf16.mxu1 %vm769_vm1, %v2718_v57  ;;  %v2728_v57 = vld [vmem:[%s3127_s1 + $0x8] sm:$0xff]  }
 0xc5e   : > { %2586 = vmatmul.mubr.msk.bf16.vlgmr.msra.gmra.mxu1 %vm769_vm1, %v2719_v58  ;;  %v2729_v58 = vld [vmem:[%s3127_s1] sm:$0xff]  }
 0xc5f   : > { %2598 = vmatpush3.bf16.msra.mxu1 %v2722_v47 }
 0xc60   : > { %2599 = vmatprep.subr.bf16.mxu1 %v2723_v48 }
 0xc63   : > { %2600 = vmatpush3.bf16.msra.mxu1 %v2723_v48 }
 0xc64   : > { %2601 = vmatprep.subr.bf16.mxu1 %v2724_v49 }
 0xc67   : > { %2602 = vmatpush3.bf16.msra.mxu1 %v2724_v49 }
 0xc68   : > { %2603 = vmatprep.subr.bf16.mxu1 %v2725_v52 }
 0xc6b   : > { %2604 = vmatpush3.bf16.msra.mxu1 %v2725_v52 }
 0xc6c   : > { %2605 = vmatprep.subr.bf16.mxu1 %v2726_v54 }
 0xc6f   : > { %2606 = vmatpush3.bf16.msra.mxu1 %v2726_v54 }
 0xc70   : > { %2607 = vmatprep.subr.bf16.mxu1 %v2727_v56 }
 0xc73   : > { %2608 = vmatpush3.bf16.msra.mxu1 %v2727_v56 }
 0xc74   : > { %2609 = vmatprep.subr.bf16.mxu1 %v2728_v57 }
 0xc77   : > { %2610 = vmatpush3.bf16.msra.mxu1 %v2728_v57 }
 0xc78   : > { %2611 = vmatprep.subr.bf16.mxu1 %v2729_v58 }
 0xc7b   : > { %2612 = vmatpush3.bf16.msra.mxu1 %v2729_v58 }
 0xd1e   : > { %v2587_v59 = vpop.f32.mrf.mxu1 }
 0xd1f   : > { %v1770_v6 = vadd.f32 %v2587_v59, %v3140_v4  ;;  %v2418_v59 = vld [vmem:[%s743_s18] ss:$0 sm:$0xff] }
 0xd20   : > { %v1754_v61 = vpop.f32.mrf.mxu1 }
 0xd21   : > { %v1768_v62 = vadd.f32 %v1754_v61, %v3138_v3  ;;  %v3317_v3 = vadd.f32 %v2415_v63, %v1770_v6 }
 0xd22   : > { %v2588_v0 = vpop.f32.mrf.mxu1 }
 0xd23   : > { %v3309_v1 = vadd.f32 %v2415_v63, %v1768_v62  ;;  %v1789_v12 = vsel %vm769_vm1, %v3317_v3, 0.0 }
 0xd24   : > { %v1757_v2 = vpop.f32.mrf.mxu1 }
 0xd25   : > { %v1769_v7 = vadd.f32 %v1757_v2, %v3142_v5  ;;  %v1783_v9 = vsel %vm769_vm1, %v3309_v1, 0.0 }
 0xd26   : > { %1784 = vadd.xlane.f32.xlu1 %v1783_v9 }
 0xd27   : > { %v3315_v10 = vadd.f32 %v2415_v63, %v1769_v7 }
 0xd29   : > { %v1786_v11 = vsel %vm769_vm1, %v3315_v10, 0.0 }
 0xd2a   : > { %1787 = vadd.xlane.f32.xlu0 %v1786_v11 }
 0xd2e   : > { %1790 = vadd.xlane.f32.xlu0 %v1789_v12 }
 0xdaf   : > { %v1785_v13 = vpop.xlane.xlu1 %1784 }
 0xdb0   : > { %v1792_v4 = vmul.f32 0.03125, %v1785_v13 }
 0xdb2   : > { %v1795_v5 = vsub.f32 %v3309_v1, %v1792_v4 }
 0xdb3   : > { %v1788_v14 = vpop.xlane.xlu0 %1787 }
 0xdb4   : > { %v1793_v15 = vmul.f32 0.03125, %v1788_v14  ;;  %v1798_v8 = vmul.f32 %v1795_v5, %v1795_v5 }
 0xdb6   : > { %v1796_v16 = vsub.f32 %v3315_v10, %v1793_v15  ;;  %v1801_v17 = vsel %vm769_vm1, %v1798_v8, 0.0 }
 0xdb7   : > { %1802 = vadd.xlane.f32.xlu0 %v1801_v17  ;;  %v1791_v18 = vpop.xlane.xlu0 %1790 }
 0xdb8   : > { %v1794_v19 = vmul.f32 0.03125, %v1791_v18  ;;  %v1799_v20 = vmul.f32 %v1796_v16, %v1796_v16 }
 0xdba   : > { %v1797_v21 = vsub.f32 %v3317_v3, %v1794_v19  ;;  %v1804_v22 = vsel %vm769_vm1, %v1799_v20, 0.0 }
 0xdbb   : > { %1805 = vadd.xlane.f32.xlu1 %v1804_v22 }
 0xdbc   : > { %v1800_v23 = vmul.f32 %v1797_v21, %v1797_v21 }
 0xdbe   : > { %v1807_v24 = vsel %vm769_vm1, %v1800_v23, 0.0 }
 0xdbf   : > { %1808 = vadd.xlane.f32.xlu0 %v1807_v24 }
 0xe40   : > { %v1803_v25 = vpop.xlane.xlu0 %1802 }
 0xe41   : > { %v1810_v26 = vmul.f32 0.03125, %v1803_v25 }
 0xe43   : > { %v1813_v53 = vadd.f32 1e-05, %v1810_v26 }
 0xe44   : > { %v1806_v55 = vpop.xlane.xlu1 %1805 }
 0xe45   : > { %2784 = vrsqrt.f32 %v1813_v53  ;;  %v1811_v27 = vmul.f32 0.03125, %v1806_v55 }
 0xe47   : > { %v1814_v50 = vadd.f32 1e-05, %v1811_v27 }
 0xe48   : > { %v1809_v28 = vpop.xlane.xlu0 %1808 }
 0xe49   : > { %2786 = vrsqrt.f32 %v1814_v50  ;;  %v1812_v29 = vmul.f32 0.03125, %v1809_v28 }
 0xe4b   : > { %v1815_v30 = vadd.f32 1e-05, %v1812_v29 }
 0xe4d   : > { %2788 = vrsqrt.f32 %v1815_v30 }
 0xe52   : > { %v2785_v31 = vpop.eup %2784 }
 0xe53   : > { %v1819_v32 = vmul.f32 %v2785_v31, %v1795_v5 }
 0xe55   : > { %v1828_v36 = vmul.f32 %v2416_v33, %v1819_v32 }
 0xe56   : > { %v2787_v34 = vpop.eup %2786 }
 0xe57   : > { %v1820_v35 = vmul.f32 %v2787_v34, %v1796_v16  ;;  %v1837_v41 = vadd.f32 %v2417_v37, %v1828_v36 }
 0xe59   : > { %v1829_v38 = vmul.f32 %v2416_v33, %v1820_v35 }
 0xe5a   : > { %v2789_v39 = vpop.eup %2788 }
 0xe5b   : > { %v1821_v40 = vmul.f32 %v2789_v39, %v1797_v21  ;;  %v1838_v42 = vadd.f32 %v2417_v37, %v1829_v38 }
 0xe5d   : > { %v1840_v43 = vpack.c.bf16 %v1838_v42, %v1837_v41  ;;  %v1830_v44 = vmul.f32 %v2416_v33, %v1821_v40 }
 0xe5f   : > { %2593 = vmatprep.mubr.msk.bf16.mxu0 %vm769_vm1, %v1840_v43  ;;  %v1839_v45 = vadd.f32 %v2417_v37, %v1830_v44 }
 0xe61   : > { %v1841_v46 = vpack.c.bf16 %v1839_v45, %v1839_v45 }
 0xe63   : > { %2594 = vmatmul.mubr.msk.bf16.vlgmr.msra.gmra.mxu0 %vm769_vm1, %v1841_v46 }
 0xf23   : > { %v2595_v61 = vpop.f32.mrf.mxu0 }
 0xf24   : > { %v1914_v62 = vadd.f32 %v2595_v61, %v2418_v59 }
 0xf25   : > { %v1905_v63 = vpop.f32.mrf.mxu0 }
 0xf26   : > { %v1924_v0 = vmul.f32 0.70710677, %v1914_v62  ;;  %v1906_v2 = vadd.f32 %v2418_v59, %v1905_v63  ;;  %v1921_v8 = vmul.f32 0.5, %v1914_v62 }
 0xf27   : > { %v2596_v6 = vpop.f32.mrf.mxu0 }
 0xf28   : > { %v1922_v7 = vmul.f32 0.70710677, %v1906_v2  ;;  %2790 = verf.f32 %v1924_v0  ;;  %v1919_v16 = vmul.f32 0.5, %v1906_v2 }
 0xf29   : > { %v1908_v9 = vpop.f32.mrf.mxu0 }
 0xf2a   : > { %2792 = verf.f32 %v1922_v7  ;;  %v1909_v11 = vadd.f32 %v2418_v59, %v1908_v9 }
 0xf2c   : > { %v1923_v12 = vmul.f32 0.70710677, %v1909_v11  ;;  %v1920_v17 = vmul.f32 0.5, %v1909_v11 }
 0xf2e   : > { %2794 = verf.f32 %v1923_v12 }
 0xf35   : > { %v2791_v13 = vpop.eup %2790 }
 0xf36   : > { %v1930_v5 = vadd.f32 1.0, %v2791_v13 }
 0xf37   : > { %v2793_v4 = vpop.eup %2792 }
 0xf38   : > { %v1928_v14 = vadd.f32 1.0, %v2793_v4  ;;  %v1933_v19 = vmul.f32 %v1930_v5, %v1921_v8 }
 0xf3a   : > { %v1931_v20 = vmul.f32 %v1928_v14, %v1919_v16  ;;  %v1935_v23 = vpack.c.bf16 %v1933_v19, %v1933_v19 }
 0xf3b   : > { %v2795_v15 = vpop.eup %2794 }
 0xf3c   : > { %v1929_v18 = vadd.f32 1.0, %v2795_v15 }
 0xf3e   : > { %v1932_v21 = vmul.f32 %v1929_v18, %v1920_v17 }
 0xf40   : > { %v1934_v22 = vpack.c.bf16 %v1932_v21, %v1931_v20 }
 0xf42   : > { %2613 = vmatprep.mubr.bf16.mxu1 %v1934_v22 }
 0xf43   : > { %2614 = vmatmul.mubr.bf16.vlgmr.msra.gmra.mxu1 %v1935_v23 }
0x1003   : > { %v2615_v24 = vpop.f32.mrf.mxu1 }
0x1004   : > { %v2050_v51 = vadd.f32 %v2615_v24, %v3317_v3 }
0x1005   : > { %v2034_v25 = vpop.f32.mrf.mxu1 }
0x1006   : > { %v2060_v26 = vadd.f32 %v2431_v60, %v2050_v51  ;;  %v2048_v53 = vadd.f32 %v2034_v25, %v3309_v1 }
0x1007   : > { %v2616_v55 = vpop.f32.mrf.mxu1 }
0x1008   : > { %2063 = vst.msk [vmem:[#allocation2 + $0x10] sm:$0xff] %vm769_vm1, %v2060_v26  ;;  %v2058_v27 = vadd.f32 %v2431_v60, %v2048_v53 }
0x1009   : > { %v2037_v50 = vpop.f32.mrf.mxu1 }
0x100a   : > { %2061 = vst.msk [vmem:[#allocation2] sm:$0xff] %vm769_vm1, %v2058_v27  ;;  %v2049_v28 = vadd.f32 %v2037_v50, %v3315_v10  ;;  %2067 = sbr.rel (%p2432_p1) target bundleno = 4490 (0x118a), region = 96 }
0x100c   : > { %v2059_v29 = vadd.f32 %v2431_v60, %v2049_v28 }
0x100e   : > { %2062 = vst.msk [vmem:[#allocation2 + $0x8] sm:$0xff] %vm769_vm1, %v2059_v29 }
0x100f   : > { %v2070_v3 = vsel %vm769_vm1, %v2058_v27, 0.0  ;;  %v2076_v30 = vsel %vm769_vm1, %v2060_v26, 0.0  ;;  %v2073_v1 = vsel %vm769_vm1, %v2059_v29, 0.0  ;;  %v2435_v40 = vld [vmem:[%s3502_s17] ss:$0 sm:$0xff]  ;;  %vm2157_vm9 = vcmask 253952  }
0x1010   : > { %2071 = vadd.xlane.f32.xlu0 %v2070_v3  ;;  %2077 = vadd.xlane.f32.xlu1 %v2076_v30  ;;  %v2433_v2 = vld [vmem:[%s3503_s5] ss:$0 sm:$0xff] }
0x1011   : > { %v2434_v9 = vld [vmem:[%s3504_s7] ss:$0 sm:$0xff] }
0x1014   : > { %2074 = vadd.xlane.f32.xlu0 %v2073_v1 }
0x1099   : > { %v2072_v31 = vpop.xlane.xlu0 %2071  ;;  %v2078_v41 = vpop.xlane.xlu1 %2077 }
0x109a   : > { %v2079_v32 = vmul.f32 0.03125, %v2072_v31  ;;  %v2081_v42 = vmul.f32 0.03125, %v2078_v41 }
0x109c   : > { %v2082_v33 = vsub.f32 %v2058_v27, %v2079_v32  ;;  %v2084_v43 = vsub.f32 %v2060_v26, %v2081_v42 }
0x109d   : > { %v2075_v34 = vpop.xlane.xlu0 %2074 }
0x109e   : > { %v2080_v10 = vmul.f32 0.03125, %v2075_v34  ;;  %v2085_v35 = vmul.f32 %v2082_v33, %v2082_v33  ;;  %v2087_v44 = vmul.f32 %v2084_v43, %v2084_v43 }
0x10a0   : > { %v2083_v36 = vsub.f32 %v2059_v29, %v2080_v10  ;;  %v2088_v37 = vsel %vm769_vm1, %v2085_v35, 0.0  ;;  %v2094_v45 = vsel %vm769_vm1, %v2087_v44, 0.0 }
0x10a1   : > { %2089 = vadd.xlane.f32.xlu1 %v2088_v37 }
0x10a2   : > { %v2086_v38 = vmul.f32 %v2083_v36, %v2083_v36 }
0x10a4   : > { %v2091_v39 = vsel %vm769_vm1, %v2086_v38, 0.0 }
0x10a5   : > { %2092 = vadd.xlane.f32.xlu0 %v2091_v39 }
0x10b2   : > { %2137 = vbcast.lane.b32.xlu1 %v2435_v40, 264 }
0x10bb   : > { %2133 = vbcast.lane.b32.xlu0 %v2435_v40, 256 }
0x10d6   : > { %2095 = vadd.xlane.f32.xlu1 %v2094_v45 }
0x10e7   : > { %2141 = vbcast.lane.b32.xlu1 %v2435_v40, 272 }
0x112a   : > { %v2090_v47 = vpop.xlane.xlu1 %2089 }
0x112b   : > { %v2097_v49 = vmul.f32 0.03125, %v2090_v47 }
0x112d   : > { %v2100_v54 = vadd.f32 1e-05, %v2097_v49 }
0x112e   : > { %v2093_v46 = vpop.xlane.xlu0 %2092  ;;  %v2138_v56 = vpop.permute.xlu1 %2137 }
0x112f   : > { %v2098_v48 = vmul.f32 0.03125, %v2093_v46 }
0x1131   : > { %v2101_v52 = vadd.f32 1e-05, %v2098_v48 }
0x1132   : > { %v2134_v4 = vpop.permute.xlu0 %2133 }
0x1133   : > { %2796 = vrsqrt.f32 %v2101_v52 }
0x1134   : > { %2798 = vrsqrt.f32 %v2100_v54 }
0x1140   : > { %v2797_v61 = vpop.eup %2796 }
0x1141   : > { %v2799_v62 = vpop.eup %2798  ;;  %v2107_v63 = vmul.f32 %v2797_v61, %v2083_v36 }
0x1142   : > { %v2106_v0 = vmul.f32 %v2799_v62, %v2082_v33 }
0x1143   : > { %v2116_v6 = vmul.f32 %v2433_v2, %v2107_v63 }
0x1144   : > { %v2115_v7 = vmul.f32 %v2433_v2, %v2106_v0 }
0x1145   : > { %v2125_v11 = vadd.f32 %v2434_v9, %v2116_v6 }
0x1146   : > { %v2124_v12 = vadd.f32 %v2434_v9, %v2115_v7 }
0x1147   : > { %v2144_v5 = vmul.f32 %v2138_v56, %v2125_v11 }
0x1148   : > { %v2143_v15 = vmul.f32 %v2134_v4, %v2124_v12 }
0x1149   : > { %v2147_v17 = vsel %vm769_vm1, %v2144_v5, 0.0 }
0x114a   : > { %v2146_v19 = vsel %vm769_vm1, %v2143_v15, 0.0 }
0x114b   : > { %v2148_v21 = vadd.f32 %v2147_v17, %v2146_v19 }
0x115f   : > { %v2096_v57 = vpop.xlane.xlu1 %2095 }
0x1160   : > { %v2099_v58 = vmul.f32 0.03125, %v2096_v57 }
0x1162   : > { %v2102_v59 = vadd.f32 1e-05, %v2099_v58 }
0x1163   : > { %v2142_v16 = vpop.permute.xlu1 %2141 }
0x1164   : > { %2800 = vrsqrt.f32 %v2102_v59 }
0x1171   : > { %v2801_v13 = vpop.eup %2800 }
0x1172   : > { %v2108_v14 = vmul.f32 %v2801_v13, %v2084_v43 }
0x1174   : > { %v2117_v8 = vmul.f32 %v2433_v2, %v2108_v14 }
0x1176   : > { %v2126_v18 = vadd.f32 %v2434_v9, %v2117_v8 }
0x1178   : > { %v2145_v20 = vmul.f32 %v2142_v16, %v2126_v18 }
0x117a   : > { %v2149_v22 = vsel %vm769_vm1, %v2145_v20, 0.0 }
0x117b   : > { %v2150_v23 = vadd.f32 %v2149_v22, %v2148_v21 }
0x117d   : > { %v2151_v24 = vrot.slane %v2150_v23, 4 }
0x117f   : > { %v2152_v60 = vadd.f32 %v2151_v24, %v2150_v23 }
0x1181   : > { %v2153_v51 = vrot.slane %v2152_v60, 2 }
0x1183   : > { %v2154_v25 = vadd.f32 %v2153_v51, %v2152_v60 }
0x1185   : > { %v2155_v26 = vrot.slane %v2154_v25, 1 }
0x1187   : > { %v2156_v53 = vadd.f32 %v2155_v26, %v2154_v25 }
0x1189   : > { %2158 = vst.msk [vmem:[%s3135_s21] sm:$0x1] %vm2157_vm9, %v2156_v53 }
0x118a PF: > { %s3505_s28 = sld [smem:[#allocation10_spill]]  ;;  %s2172_s29 = sshll.u32 %s3135_s21, 4  ;;  %s2173_s29 = int_to_ptr.vmem [resolvable:$true] %s2172_s29 }
0x118b   : > { %s3507_s19 = sld [smem:[#allocation27_spill]]  ;;  %s3508_s1 = sand.u32 1, %s2870_s25  }
0x118c   : > { %s2160_s18 = scalar_lea.sflag [#allocation5], %s3508_s1  ;;  %s2802_s24 = scalar_lea.vmem %s2173_s29, 16 }
0x118d   : > { %p2803_p2 = scmp.ne.s32.totalorder %s2173_s29, %s2802_s24  ;;  %s2910_s15 = smov [#allocation4]  }
0x118e   : > { %s2806_s20 = sshll.u32 %s2910_s15, 4  ;;  %s2807_s20 = int_to_ptr.vmem [resolvable:$false] %s2806_s20 }
0x118f   : > { %p2804_p4 = pnand %p2803_p2, %p3050_p3  ;;  %s2808_s17 = scalar_lea.vmem %s2807_s20, 32 }
0x1190   : > { %s2436_s22 = sshll.u32 %s3505_s28, 4  ;;  %p2809_p6 = scmp.lt.s32.totalorder %s2173_s29, %s2807_s20 }
0x1191   : > { %s2170_s30 = scalar_lea.hbm %s3507_s19, %s2436_s22  ;;  %p2805_p5 = pneg %p2804_p4 }
0x1192   : > { %p2810_p7 = scmp.lt.s32.totalorder %s2808_s17, %s2802_s24 }
0x1194   : > { %p2811_p8 = por %p2810_p7, %p2809_p6 }
0x1196   : > { %p2812_p10 = pnand %p2811_p8, %p2805_p5 }
0x1198   : > { %2815 = shalt.err (!%p2812_p10)
}
0x1199   : > { %s2816_s26 = scalar_lea.hbm %s2170_s30, 16  ;;  %s2820_s5 = scalar_lea.hbm %s3507_s19, 32 }
0x119a   : > { %p2817_p11 = scmp.ne.s32.totalorder %s2170_s30, %s2816_s26  ;;  %p2821_p0 = scmp.lt.s32.totalorder %s2170_s30, %s3507_s19 }
0x119b   : > { %p2822_p1 = scmp.lt.s32.totalorder %s2820_s5, %s2816_s26 }
0x119c   : > { %p2818_p12 = pnand %p2817_p11, %p3050_p3 }
0x119d   : > { %p2823_p2 = por %p2822_p1, %p2821_p0 }
0x119e   : > { %p2819_p13 = pneg %p2818_p12 }
0x11a0   : > { %p2824_p4 = pnand %p2823_p2, %p2819_p13 }
0x11a2   : > { %2827 = shalt.err (!%p2824_p4)
}
0x11a3   : > { %2629 = dma.vmem_to_hbm [thread:$0]  (%p3050_p3), %s2173_s29, 16, %s2170_s30, %s2160_s18  }
0x11a4 PF: > { %s3509_s7 = sld [smem:[#allocation13_spill]] }
0x11a5   : > { %s3510_s28 = sld [smem:[#allocation7_spill]] }
0x11aa   : > { %p2635_p5 = scmp.ge.s32.totalorder %s3509_s7, 2 }
0x11ab   : > { %s2184_s27 = sand.u32 1, %s3510_s28  }
0x11ac   : > { %p2632_p6 = pnand %p2635_p5, %p3060_p9  ;;  %s2185_s3 = scalar_lea.sflag [#allocation5], %s2184_s27 }
0x11ae   : > { %p2633_p7 = pneg %p2632_p6 }
0x11b0   : > { %2861 = dma.done.wait (%p2633_p7), %s2185_s3, 16  }
0x11b1   : > { %2863 = vsyncadd (%p2633_p7), %s2185_s3, 4294967280  ;;  %s30_s30 = sadd.s32 1, %s3509_s7   ;;  %s3512_s1 = sld [smem:[#allocation8_spill]] }
0x11b2   : > { %p27_p8 = scmp.ge.s32.totalorder %s30_s30, 6   ;;  %s3513_s26 = sld [smem:[#allocation18_spill]] }
0x11b3   : > { %s3514_s27 = sld [smem:[#allocation11_spill]]  ;;  %s3518_s24 = smov %s2870_s25 }
0x11b4   : > { %s3515_s28 = sld [smem:[#allocation12_spill]]  ;;  %29 = sbr.rel (!%p27_p8) target bundleno = 15 (0xf), region = 167 }
0x11b5   : > { %s3516_s29 = sld [smem:[#allocation14_spill]] }
0x11b6   : > { %s3517_s0 = sld [smem:[#allocation16_spill]] }
0x11b7   : > { %s3519_s25 = smov %s3512_s1 }
0x11b9   :  { %2189 = vsyncpa [#allocation5], 1 }
0x11ba   :  { %2191 = vsyncpa [#allocation5 + $0x1], 1 }

</bundles_post_ra>
